<compile_context>
chip_gen: v7x
topology: tpu7x:2x2x1
jax: 0.10.0
libtpu: 0.0.40
codegen_flags: <defaults>
</compile_context>

<pallas_src>
import jax
import jax.numpy as jnp
from jax import lax
from jax.experimental import pallas as pl
from jax.experimental.pallas import tpu as pltpu


def _vmem_capacity_bytes():
    """Generation-aware VMEM capacity; falls back to the smallest (v7x: 64 MiB / TC)."""
    try:
        cap = getattr(pltpu.get_tpu_info(), "vmem_capacity_bytes", None)
        if cap:
            return int(cap)
    except Exception:
        pass
    return 64 << 20


def _make_layer0_kernel(n_rows, tn, tiles_per_core, any_mask, compute_dtype):
    n_sub = tn // 8

    def kernel(x_ref, w0t_ref, b0_ref, hsum_ref):
        c = pl.program_id(0)          # per-TensorCore partial ("parallel")
        i = pl.program_id(1)          # N-tile reduction axis ("arbitrary")

        @pl.when(i == 0)
        def _init():
            hsum_ref[...] = jnp.zeros_like(hsum_ref)

        # layer0: h = relu(x @ W0^T + b0).  Dropout is identity at inference.
        # x is streamed in native dtype; cast to bf16 here (VPU work hides under MXU/DMA).
        x = x_ref[...].astype(compute_dtype)                        # (tn, D_in)
        h = jnp.dot(x, w0t_ref[...], preferred_element_type=jnp.float32)
        h = jnp.maximum(h + b0_ref[...], 0.0)                       # (tn, H) f32

        def _accum(hv):
            # Sublane-dense accumulation: (tn, H) -> (8, H) via plain VPU adds
            # (no per-step cross-sublane XLU reduce).
            hsum_ref[...] += hv.reshape(n_sub, 8, hv.shape[-1]).sum(axis=0)

        if any_mask:
            t = c * tiles_per_core + i            # intended (unclamped) tile index
            is_full = (t + 1) * tn <= n_rows

            @pl.when(is_full)
            def _full():
                _accum(h)

            @pl.when(jnp.logical_not(is_full))
            def _edge():
                # Zero rows past the true N: covers the partial edge tile and any
                # phantom tile created by the per-core split.  Mask stays downstream
                # of every op that touched the (undefined) padded rows -> NaN-safe.
                row = t * tn + lax.broadcasted_iota(jnp.int32, h.shape, 0)
                _accum(jnp.where(row < n_rows, h, 0.0))
        else:
            _accum(h)

    return kernel


def simple_mlp_forward(x, w0, b0, w1, b1, *, tile_n=512, compute_dtype=jnp.bfloat16):
    """x: (N, n_inputs). w0: (n_hiddens, n_inputs), b0: (n_hiddens,),
    w1: (n_outputs, n_hiddens), b1: (n_outputs,) -- PyTorch nn.Linear layout."""
    x = jnp.asarray(x)
    n_rows, d_in = x.shape
    n_hiddens = w0.shape[0]

    # --- Tile selection over N: big tiles; prefer one that divides N (kills the mask). ---
    tn = min(int(tile_n), ((n_rows + 7) // 8) * 8)
    tn = max(8, (tn // 8) * 8)
    for cand in range(tn, max(8, tn // 2) - 1, -8):
        if n_rows % cand == 0:
            tn = cand
            break
    total_tiles = pl.cdiv(n_rows, tn)

    # --- v7x: split the reduction across both TensorCores (per-core partial sums). ---
    num_cores = 2 if total_tiles >= 2 else 1
    tiles_per_core = pl.cdiv(total_tiles, num_cores)
    has_phantom = num_cores * tiles_per_core > total_tiles
    any_mask = has_phantom or (n_rows % tn != 0)
    last_tile = total_tiles - 1

    if has_phantom:
        def x_index_map(c, i):
            # Clamp phantom tiles onto a valid block; their rows are masked to zero.
            return (jnp.minimum(c * tiles_per_core + i, last_tile), 0)
    else:
        def x_index_map(c, i):
            return (c * tiles_per_core + i, 0)

    # One-time wrapper prep of the small resident operands.  W0 is transposed once so
    # the in-kernel dot is canonical (M,K)x(K,N): no per-step transpose.
    w0t_c = jnp.asarray(w0, jnp.float32).T.astype(compute_dtype)    # (D_in, H) bf16
    b0_2 = jnp.asarray(b0, jnp.float32)[None, :]                    # (1, H) f32

    # --- VMEM budget: proportional headroom, clamped by the chip's actual capacity. ---
    x_item = jnp.dtype(x.dtype).itemsize
    c_item = jnp.dtype(compute_dtype).itemsize
    vmem_need = (
        2 * tn * d_in * x_item            # double-buffered x tile (native dtype)
        + 2 * d_in * n_hiddens * c_item   # resident W0^T (Pallas double-buffers by default)
        + 2 * 8 * n_hiddens * 4           # b0 (padded to a sublane tile)
        + 2 * 8 * n_hiddens * 4           # per-core partial-sum output block
        + tn * n_hiddens * 4              # h intermediate
    )
    vmem_limit = int(min(2 * _vmem_capacity_bytes() // 3,
                         max(2 * vmem_need + (4 << 20), 16 << 20)))

    cost = pl.CostEstimate(
        flops=2 * n_rows * d_in * n_hiddens,
        transcendentals=0,
        bytes_accessed=(n_rows * d_in * x_item
                        + d_in * n_hiddens * c_item
                        + n_hiddens * 4
                        + num_cores * 8 * n_hiddens * 4),
    )

    kernel = _make_layer0_kernel(n_rows, tn, tiles_per_core, any_mask, compute_dtype)

    hsum_partial = pl.pallas_call(
        kernel,
        out_shape=jax.ShapeDtypeStruct((num_cores * 8, n_hiddens), jnp.float32),
        grid_spec=pltpu.PrefetchScalarGridSpec(
            num_scalar_prefetch=0,
            grid=(num_cores, tiles_per_core),
            in_specs=[
                pl.BlockSpec((tn, d_in), x_index_map),                    # x: streamed over N
                pl.BlockSpec((d_in, n_hiddens), lambda c, i: (0, 0)),     # W0^T: resident
                pl.BlockSpec((1, n_hiddens), lambda c, i: (0, 0)),        # b0: resident
            ],
            out_specs=pl.BlockSpec((8, n_hiddens), lambda c, i: (c, 0)),  # per-core partial sum
        ),
        compiler_params=pltpu.CompilerParams(
            dimension_semantics=("parallel", "arbitrary"),
            vmem_limit_bytes=vmem_limit,
        ),
        cost_estimate=cost,
    )(x, w0t_c, b0_2)

    # --- Tiny epilogue in plain JAX (exact softmax; one-shot ~2*H*C FLOPs). ---
    # Linearity: mean_N(h @ W1^T + b1) == (mean_N h) @ W1^T + b1.
    h_mean = jnp.sum(hsum_partial, axis=0, keepdims=True) * (1.0 / n_rows)          # (1, H)
    logits = h_mean @ jnp.asarray(w1, jnp.float32).T + jnp.asarray(b1, jnp.float32)[None, :]
    y_prob = jax.nn.softmax(logits, axis=1)
    y_hat = jnp.argmax(logits, axis=1, keepdims=True).astype(jnp.int32)              # top-1
    return {"logits": logits, "Y_prob": y_prob, "Y_hat": y_hat}


def _reference_forward(x, w0, b0, w1, b1, compute_dtype=jnp.bfloat16):
    # Reference uses identically bf16-rounded x/W0, so the only differences vs. the kernel
    # are accumulation order and the (mathematically exact) mean/W1 reassociation.
    xq = x.astype(compute_dtype).astype(jnp.float32)
    w0q = jnp.asarray(w0).astype(compute_dtype).astype(jnp.float32)
    h = jnp.maximum(xq @ w0q.T + b0[None, :], 0.0)
    y = h @ jnp.asarray(w1, jnp.float32).T + b1[None, :]
    logits = jnp.mean(y, axis=0, keepdims=True)
    y_prob = jax.nn.softmax(logits, axis=1)
    y_hat = jnp.argmax(logits, axis=1, keepdims=True).astype(jnp.int32)
    return logits, y_prob, y_hat


if __name__ == "__main__":
    # Bag of N instances with n_inputs features each (MIL-style aggregator input).
    # N chosen so the run exercises both the dual-core split (2 tiles of 512 rows) and the
    # pl.when-gated edge-tile mask (N % 512 != 0); hidden/output dims are lane-dense.
    N, n_inputs, n_hiddens, n_outputs = 1000, 256, 256, 128

    key = jax.random.PRNGKey(0)
    kx, k0w, k0b, k1w, k1b = jax.random.split(key, 5)

    x = jax.random.normal(kx, (N, n_inputs), dtype=jnp.float32)
    # Parameter shapes follow nn.Linear: weight=(out, in), bias=(out,).
    w0 = jax.random.normal(k0w, (n_hiddens, n_inputs), dtype=jnp.float32) * 0.1
    b0 = jax.random.normal(k0b, (n_hiddens,), dtype=jnp.float32) * 0.1
    w1 = jax.random.normal(k1w, (n_outputs, n_hiddens), dtype=jnp.float32) * 0.1
    b1 = jax.random.normal(k1b, (n_outputs,), dtype=jnp.float32) * 0.1

    out = simple_mlp_forward(x, w0, b0, w1, b1)
    jax.block_until_ready(out)

    ref_logits, ref_prob, ref_hat = _reference_forward(x, w0, b0, w1, b1)

    assert out["logits"].shape == (1, n_outputs)
    assert out["Y_prob"].shape == (1, n_outputs)
    assert out["Y_hat"].shape == (1, 1)
    assert jnp.allclose(out["logits"], ref_logits, atol=2e-3, rtol=2e-3), (
        float(jnp.max(jnp.abs(out["logits"] - ref_logits))))
    assert jnp.allclose(out["Y_prob"], ref_prob, atol=1e-2, rtol=1e-2), (
        float(jnp.max(jnp.abs(out["Y_prob"] - ref_prob))))
    assert jnp.array_equal(out["Y_hat"], ref_hat)

    print("KERNEL_OK")
</pallas_src>

<mosaic_0001>
module attributes {stable_mosaic.version = 11 : i64} {
  func.func @kernel(%arg0: i32, %arg1: i32, %arg2: memref<512x256xf32, #tpu.memory_space<vmem>>, %arg3: memref<256x256xbf16, #tpu.memory_space<vmem>>, %arg4: memref<1x256xf32, #tpu.memory_space<vmem>>, %arg5: memref<8x256xf32, #tpu.memory_space<vmem>>) attributes {dimension_semantics = [#tpu.dimension_semantics<parallel>, #tpu.dimension_semantics<arbitrary>], iteration_bounds = array<i64: 2, 1>, scalar_prefetch = 0 : i64, scratch_operands = 0 : i64, tpu.core_type = #tpu.core_type<tc>, window_params = [{transform_indices = @transform_0, window_bounds = array<i64: 512, 256>}, {pipeline_mode = #tpu.pipeline_mode<synchronous>, transform_indices = @transform_1, window_bounds = array<i64: 256, 256>}, {pipeline_mode = #tpu.pipeline_mode<synchronous>, transform_indices = @transform_2, window_bounds = array<i64: 1, 256>}, {transform_indices = @transform_3, window_bounds = array<i64: 8, 256>}]} {
    %c0_i32 = arith.constant 0 : i32
    %0 = arith.cmpi eq, %arg1, %c0_i32 : i32
    %1 = arith.extui %0 : i1 to i32
    %c0_i32_0 = arith.constant 0 : i32
    %2 = arith.cmpi ne, %1, %c0_i32_0 : i32
    scf.if %2 {
      %cst_10 = arith.constant 0.000000e+00 : f32
      %22 = vector.broadcast %cst_10 : f32 to vector<8x256xf32>
      %c0_11 = arith.constant 0 : index
      %c0_12 = arith.constant 0 : index
      %23 = vector.load %arg5[%c0_11, %c0_12] : memref<8x256xf32, #tpu.memory_space<vmem>>, vector<8x256xf32>
      tpu.vector_store %arg5[%c0_11, %c0_12], %22 {strides = array<i32>} : memref<8x256xf32, #tpu.memory_space<vmem>>, vector<8x256xf32>,
    } else {
    }
    %c0 = arith.constant 0 : index
    %c0_1 = arith.constant 0 : index
    %3 = vector.load %arg2[%c0, %c0_1] : memref<512x256xf32, #tpu.memory_space<vmem>>, vector<512x256xf32>
    %4 = arith.truncf %3 : vector<512x256xf32> to vector<512x256xbf16>
    %c0_2 = arith.constant 0 : index
    %c0_3 = arith.constant 0 : index
    %5 = vector.load %arg3[%c0_2, %c0_3] : memref<256x256xbf16, #tpu.memory_space<vmem>>, vector<256x256xbf16>
    %cst = arith.constant dense<0.000000e+00> : vector<512x256xf32>
    %6 = tpu.matmul %4, %5, %cst {dimension_numbers = #tpu.dot_dimension_numbers<[1], [0], [0], [1], [0, 0, 1, 1], [], []>} : vector<512x256xbf16>, vector<256x256xbf16>, vector<512x256xf32> -> vector<512x256xf32>
    %c0_4 = arith.constant 0 : index
    %c0_5 = arith.constant 0 : index
    %7 = vector.load %arg4[%c0_4, %c0_5] : memref<1x256xf32, #tpu.memory_space<vmem>>, vector<1x256xf32>
    %8 = vector.broadcast %7 : vector<1x256xf32> to vector<512x256xf32>
    %9 = arith.addf %6, %8 : vector<512x256xf32>
    %cst_6 = arith.constant 0.000000e+00 : f32
    %10 = vector.broadcast %cst_6 : f32 to vector<512x256xf32>
    %11 = arith.maximumf %9, %10 : vector<512x256xf32>
    %c1_i32 = arith.constant 1 : i32
    %12 = arith.muli %arg0, %c1_i32 : i32
    %13 = arith.addi %12, %arg1 : i32
    %c1_i32_7 = arith.constant 1 : i32
    %14 = arith.addi %13, %c1_i32_7 : i32
    %c512_i32 = arith.constant 512 : i32
    %15 = arith.muli %14, %c512_i32 : i32
    %c1000_i32 = arith.constant 1000 : i32
    %16 = arith.cmpi sle, %15, %c1000_i32 : i32
    %17 = arith.extui %16 : i1 to i32
    %c0_i32_8 = arith.constant 0 : i32
    %18 = arith.cmpi ne, %17, %c0_i32_8 : i32
    scf.if %18 {
      %c0_10 = arith.constant 0 : index
      %c0_11 = arith.constant 0 : index
      %22 = vector.load %arg5[%c0_10, %c0_11] : memref<8x256xf32, #tpu.memory_space<vmem>>, vector<8x256xf32>
      %23 = vector.shape_cast %11 : vector<512x256xf32> to vector<64x8x256xf32>
      %cst_12 = arith.constant dense<0.000000e+00> : vector<8x256xf32>
      %24 = vector.multi_reduction <add>, %23, %cst_12 [0] : vector<64x8x256xf32> to vector<8x256xf32>
      %25 = arith.addf %22, %24 : vector<8x256xf32>
      %c0_13 = arith.constant 0 : index
      %c0_14 = arith.constant 0 : index
      %26 = vector.load %arg5[%c0_13, %c0_14] : memref<8x256xf32, #tpu.memory_space<vmem>>, vector<8x256xf32>
      tpu.vector_store %arg5[%c0_13, %c0_14], %25 {strides = array<i32>} : memref<8x256xf32, #tpu.memory_space<vmem>>, vector<8x256xf32>,
    } else {
    }
    %true = arith.constant true
    %19 = arith.xori %16, %true : i1
    %20 = arith.extui %19 : i1 to i32
    %c0_i32_9 = arith.constant 0 : i32
    %21 = arith.cmpi ne, %20, %c0_i32_9 : i32
    scf.if %21 {
      %c512_i32_10 = arith.constant 512 : i32
      %22 = arith.muli %13, %c512_i32_10 : i32
      %23 = tpu.iota {dimensions = array<i32: 0>} : vector<512x256xi32>
      %24 = vector.broadcast %22 : i32 to vector<512x256xi32>
      %25 = arith.addi %24, %23 : vector<512x256xi32>
      %c1000_i32_11 = arith.constant 1000 : i32
      %26 = vector.broadcast %c1000_i32_11 : i32 to vector<512x256xi32>
      %27 = arith.cmpi slt, %25, %26 : vector<512x256xi32>
      %cst_12 = arith.constant 0.000000e+00 : f32
      %28 = vector.broadcast %cst_12 : f32 to vector<512x256xf32>
      %29 = arith.select %27, %11, %28 : vector<512x256xi1>, vector<512x256xf32>
      %c0_13 = arith.constant 0 : index
      %c0_14 = arith.constant 0 : index
      %30 = vector.load %arg5[%c0_13, %c0_14] : memref<8x256xf32, #tpu.memory_space<vmem>>, vector<8x256xf32>
      %31 = vector.shape_cast %29 : vector<512x256xf32> to vector<64x8x256xf32>
      %cst_15 = arith.constant dense<0.000000e+00> : vector<8x256xf32>
      %32 = vector.multi_reduction <add>, %31, %cst_15 [0] : vector<64x8x256xf32> to vector<8x256xf32>
      %33 = arith.addf %30, %32 : vector<8x256xf32>
      %c0_16 = arith.constant 0 : index
      %c0_17 = arith.constant 0 : index
      %34 = vector.load %arg5[%c0_16, %c0_17] : memref<8x256xf32, #tpu.memory_space<vmem>>, vector<8x256xf32>
      tpu.vector_store %arg5[%c0_16, %c0_17], %33 {strides = array<i32>} : memref<8x256xf32, #tpu.memory_space<vmem>>, vector<8x256xf32>,
    } else {
    }
    return
  }
  func.func @transform_0(%arg0: i32, %arg1: i32) -> (i32, i32) {
    %c1_i32 = arith.constant 1 : i32
    %0 = arith.muli %arg0, %c1_i32 : i32
    %1 = arith.addi %0, %arg1 : i32
    %c0_i32 = arith.constant 0 : i32
    %c0_i32_0 = arith.constant 0 : i32
    return %1, %c0_i32 : i32, i32
  }
  func.func @transform_1(%arg0: i32, %arg1: i32) -> (i32, i32) {
    %c0_i32 = arith.constant 0 : i32
    %c0_i32_0 = arith.constant 0 : i32
    %c0_i32_1 = arith.constant 0 : i32
    return %c0_i32, %c0_i32_0 : i32, i32
  }
  func.func @transform_2(%arg0: i32, %arg1: i32) -> (i32, i32) {
    %c0_i32 = arith.constant 0 : i32
    %c0_i32_0 = arith.constant 0 : i32
    %c0_i32_1 = arith.constant 0 : i32
    return %c0_i32, %c0_i32_0 : i32, i32
  }
  func.func @transform_3(%arg0: i32, %arg1: i32) -> (i32, i32) {
    %c0_i32 = arith.constant 0 : i32
    %c0_i32_0 = arith.constant 0 : i32
    return %arg0, %c0_i32 : i32, i32
  }
}

</mosaic_0001>

<bundles_post_ra>
// kernel: tpu_custom_call.1
= control target key start
LH: loop header
LB: loop body
LE: loop exit
PB: predicated region body
PF: predicated region fallthrough
CT: control target
= control target key end

     0   :  { %8 = vsyncpa [#allocation3], 0  ;;  %s3733_s0 = inlined_call_operand.hbm [shape: f32[1000,256], index: 0, kind: input, shape index: {}]   ;;  %s3734_s1 = inlined_call_operand.hbm [shape: bf16[256,256], index: 1, kind: input, shape index: {}]   ;;  %s3735_s2 = inlined_call_operand.vmem [shape: f32[1,256], index: 2, kind: input, shape index: {}]   ;;  %s3736_s3 = inlined_call_operand.hbm [shape: f32[16,256], index: 3, kind: output, shape index: {}]  }
   0x1   :  { %10 = vsyncpa [#allocation3 + $0x1], 0 }
   0x2   :  { %11 = vsyncpa [#allocation6], 0 }
   0x3   :  { %12 = vsyncpa [#allocation4], 0 }
   0x4   :  { %14 = vsyncpa [#allocation4 + $0x1], 0  ;;  %s2208_s12 = smov 0   ;;  %s2210_s13 = smov 0  }
   0x5   :  { %s2212_s14 = smov 0   ;;  %s2214_s15 = smov 0  }
   0x6   :  { %s2216_s16 = smov 0   ;;  %s2218_s17 = smov 0  }
   0x7 LB: > { %s1819_s18 = sadd.s32 4294967295, %s2178_s17   ;;  %s1820_s19 = sadd.s32 4294967294, %s2178_s17   ;;  %s2178_s17 = sphi %s2218_s17, %s20_s17   ;;  %s2174_s16 = sphi %s2216_s16, %s4357_s16   ;;  %s2170_s15 = sphi %s2214_s15, %s4356_s15   ;;  %s2166_s14 = sphi %s2212_s14, %s4355_s14   ;;  %s2162_s13 = sphi %s2210_s13, %s4354_s13   ;;  %s2158_s12 = sphi %s2208_s12, %s4353_s12  }
   0x8   : > { %s32_s20 = sadd.s32 1, %s2174_s16  ;;  %s41_s21 = sadd.s32 1, %s2166_s14 }
   0x9   : > { %p34_p0 = scmp.ge.s32.totalorder %s32_s20, 2  ;;  %p48_p1 = scmp.ne.s32.totalorder %s2166_s14, %s2162_s13 }
   0xa   : > { %p49_p2 = scmp.eq.s32.totalorder %s2178_s17, 0  ;;  %p54_p3 = scmp.ne.s32.totalorder %s2162_s13, %s2158_s12 }
   0xb   : > { %s4359_s20 = smov (%p34_p0, %s32_s20), 0  ;;  %p2253_p5 = scmp.eq.s32.totalorder %s1819_s18, 0 }
   0xc   : > { %p2249_p4 = por %p49_p2, %p48_p1  ;;  %s38_s24 = ssub.s32 %s2174_s16, %s4359_s20 }
   0xd   : > { %s3832_s23 = scalar_select %p2253_p5, 1, 0 }
   0xe   : > { %s3831_s22 = scalar_select %p2249_p4, 1, 0 }
   0xf   : > { %p120_p6 = scmp.eq.s32.totalorder %s1819_s18, 1  ;;  %p39_p7 = scmp.eq.s32.totalorder %s38_s24, 0 }
  0x10   : > { %p2261_p8 = por %p2253_p5, %p54_p3  ;;  %p126_p10 = scmp.eq.s32.totalorder %s1820_s19, 1 }
  0x11   : > { %p2265_p9 = por %p120_p6, %p48_p1  ;;  %p1821_p12 = scmp.ge.s32.totalorder %s2178_s17, 1 }
  0x12   : > { %s3833_s25 = scalar_select %p2261_p8, 1, 0 }
  0x13   : > { %s3834_s26 = scalar_select %p2265_p9, 1, 0 }
  0x14   : > { %s2270_s27 = scalar_select %p39_p7, %s2166_s14, %s41_s21  }
  0x15   : > { %p2272_p11 = por %p126_p10, %p54_p3  ;;  %p133_p13 = scmp.lt.s32.totalorder %s2178_s17, 3 }
  0x16   : > { %s2180_s30 = smov [#allocation5]   ;;  %s2036_s8 = scalar_lea.hbm %s3734_s1, 4096 }
  0x17   : > { %s3835_s28 = scalar_select %p2272_p11, 1, 0 }
  0x18   : > { %p2278_p0 = pnand %p1821_p12, %p133_p13  ;;  %s145_s4 = sshll.u32 %s2180_s30, 4  ;;  %s146_s4 = int_to_ptr.vmem [resolvable:$true] %s145_s4 }
  0x19   : > { %p2037_p3 = scmp.ne.s32.totalorder %s3734_s1, %s2036_s8  ;;  %p2043_p12 = scmp.lt.u32.totalorder %s2036_s8, %s3734_s1 }
  0x1a   : > { %s3836_s29 = scalar_select %p2278_p0, 1, 0 }
  0x1b   : > { %p1923_p1 = pneg %p2278_p0 }
  0x1d   : > { %p2286_p2 = pnand %p1923_p1, %p2253_p5 }
  0x1f   : > { %p2038_p6 = pneg %p2286_p2 }
  0x21   : > { %p2039_p7 = pnand %p2038_p6, %p2037_p3 }
  0x23   : > { %p2040_p10 = pneg %p2039_p7 }
  0x25   : > { %p2045_p13 = pnand %p2043_p12, %p2040_p10 }
  0x27   : > { %2048 = shalt.err (!%p2045_p13)
}
  0x28   : > { %s2049_s19 = scalar_lea.vmem %s146_s4, 4096  ;;  %p2057_p5 = scmp.lt.s32.totalorder %s146_s4, %s146_s4 }
  0x29   : > { %p2050_p1 = scmp.ne.s32.totalorder %s146_s4, %s2049_s19  ;;  %p2058_p8 = scmp.lt.s32.totalorder %s2049_s19, %s2049_s19 }
  0x2b   : > { %p2052_p11 = pnand %p2050_p1, %p2038_p6  ;;  %p2059_p0 = por %p2058_p8, %p2057_p5 }
  0x2d   : > { %p2053_p9 = pneg %p2052_p11 }
  0x2f   : > { %p2060_p4 = pnand %p2059_p0, %p2053_p9 }
  0x31   : > { %2063 = shalt.err (!%p2060_p4)
}
  0x32   : > { %s2181_s21 = smov 128   ;;  %s2182_s24 = smov 8  }
  0x33   : > { %1926 = dma.hbm_to_vmem [thread:$0]  (!%p2286_p2), %s3734_s1, 4096, %s146_s4, [#allocation6], %s2181_s21, %s2181_s21, %s2182_s24  }
  0x34   : > { %p1823_p3 = scmp.ge.s32.totalorder %s2178_s17, 2 }
  0x35   : > { %p3838_p11 = scmp.ne.s32.totalorder (!%p1823_p3), %s3831_s22, 0 }
  0x36   : > { %158 = sbr.rel (%p1823_p3) target bundleno = 96 (0x60), region = 24 }
  0x3d   : > { %161 = sbr.rel (!%p3838_p11) target bundleno = 96 (0x60), region = 28  ;;  %s162_s7 = sand.u32 (%p3838_p11), 1, %s2166_s14  }
  0x3e   : > { %s1825_s8 = sshll.u32 (%p3838_p11), %s2174_s16, 6  ;;  %s1824_s9 = sshll.u32 (%p3838_p11), %s162_s7, 10 }
  0x3f   : > { %s169_s10 = ssub.s32 (%p3838_p11), 125, %s1825_s8  ;;  %s2316_s11 = scalar_lea.sflag (%p3838_p11), [#allocation3], %s162_s7 }
  0x40   : > { %p170_p4 = scmp.lt.s32.totalorder (%p3838_p11), %s169_s10, 64  ;;  %s166_s18 = scalar_lea.vmem (%p3838_p11), [#allocation2], %s1824_s9 }
  0x44   : > { %s4361_s10 = smov (!%p170_p4, %s169_s10), 64 }
  0x45   : > { %s2313_s5 = sshll.u32 %s4361_s10, 8 }
  0x46   : > { %s175_s4 = ssub.s32 16384, %s2313_s5 }
  0x47   : > { %176 = vsyncadd %s2316_s11, %s175_s4  ;;  %p1828_p5 = scmp.ne.s32.totalorder %s2313_s5, 0  ;;  %s1880_s22 = sshll.u32 %s2174_s16, 14 }
  0x48   : > { %s2324_s24 = scalar_lea.hbm %s3733_s0, %s1880_s22  ;;  %s182_s30 = sshll.u32 %s166_s18, 4  ;;  %s2326_s30 = int_to_ptr.vmem [resolvable:$true] %s182_s30 }
  0x49   : > { %s2064_s6 = scalar_lea.hbm %s2324_s24, %s2313_s5  ;;  %s2068_s9 = scalar_lea.hbm %s3733_s0, 32000 }
  0x4a   : > { %p2065_p8 = scmp.ne.s32.totalorder %s2324_s24, %s2064_s6  ;;  %p2069_p2 = scmp.lt.u32.totalorder %s2324_s24, %s3733_s0 }
  0x4b   : > { %p2070_p6 = scmp.lt.u32.totalorder %s2068_s9, %s2064_s6  ;;  %p2072_p10 = scmp.lt.u32.totalorder %s2064_s6, %s2324_s24 }
  0x4c   : > { %p2066_p9 = pnand %p2065_p8, %p1828_p5 }
  0x4d   : > { %p2071_p7 = por %p2070_p6, %p2069_p2 }
  0x4e   : > { %p2067_p0 = pneg %p2066_p9 }
  0x4f   : > { %p2073_p12 = por %p2072_p10, %p2071_p7 }
  0x51   : > { %p2074_p13 = pnand %p2073_p12, %p2067_p0 }
  0x53   : > { %2077 = shalt.err (!%p2074_p13)
}
  0x54   : > { %s2078_s18 = scalar_lea.vmem %s2326_s30, %s2313_s5  ;;  %s2183_s22 = smov [#allocation2]  }
  0x55   : > { %p2079_p1 = scmp.ne.s32.totalorder %s2326_s30, %s2078_s18  ;;  %s2082_s19 = sshll.u32 %s2183_s22, 4  ;;  %s2083_s19 = int_to_ptr.vmem [resolvable:$false] %s2082_s19 }
  0x56   : > { %s2084_s21 = scalar_lea.vmem %s2083_s19, 32768  ;;  %p2085_p8 = scmp.lt.s32.totalorder %s2326_s30, %s2083_s19 }
  0x57   : > { %p2080_p11 = pnand %p2079_p1, %p1828_p5  ;;  %p2086_p9 = scmp.lt.s32.totalorder %s2084_s21, %s2078_s18 }
  0x59   : > { %p2081_p4 = pneg %p2080_p11  ;;  %p2087_p2 = por %p2086_p9, %p2085_p8 }
  0x5b   : > { %p2088_p6 = pnand %p2087_p2, %p2081_p4 }
  0x5d   : > { %2091 = shalt.err (!%p2088_p6)
}
  0x5e   : > { %s2184_s6 = smov 256   ;;  %s2185_s7 = smov 16  }
  0x5f   : > { %188 = dma.hbm_to_vmem [thread:$0]  (%p1828_p5), %s2324_s24, %s2313_s5, %s2326_s30, %s2316_s11, %s2184_s6, %s2184_s6, %s2185_s7  }
  0x60 PF: > { %p3839_p0 = scmp.ne.s32.totalorder %s3836_s29, 0 }
  0x62   : > { %194 = sbr.rel (%p3839_p0) target bundleno = 820 (0x334), region = 32 }
  0x69   : > { %s2356_s8 = sand.u32 1, %s2162_s13   ;;  %p3840_p7 = scmp.ne.s32.totalorder %s3833_s25, 0 }
  0x6a   : > { %s1834_s9 = sshll.u32 %s2356_s8, 10  ;;  %s197_s10 = scalar_lea.sflag [#allocation3], %s2356_s8 }
  0x6b   : > { %s2360_s4 = scalar_lea.vmem [#allocation2], %s1834_s9 }
  0x6c   : > { %2145 = dma.done.wait (%p3840_p7), %s197_s10, 16384  }
  0x6d   : > { %2147 = vsyncadd (%p3840_p7), %s197_s10, 4294950912  ;;  %p3841_p5 = scmp.ne.s32.totalorder %s3832_s23, 0 }
  0x6f   : > { %2149 = dma.done.wait (%p3841_p5), [#allocation6], 4096  }
  0x70   : > { %2151 = vsyncadd (%p3841_p5), [#allocation6], 4294963200  ;;  %s1836_s29 = sshll.u32 %s2356_s8, 4  ;;  %v2186_v0 = vmov 0.0   ;;  %v1988_v1 = vld [vmem:[#allocation5 + $0x4] ss:$8 sps:$4 sm:$0xff]  }
  0x71   : > { %s2371_s5 = scalar_lea.vmem [#allocation7], %s1836_s29  ;;  %v1990_v2 = vld [vmem:[#allocation5] ss:$8 sps:$4 sm:$0xff]   ;;  %636 = vmatprep.subr.bf16.mxu0 %v1988_v1  ;;  %1884 = vmatprep.subr.bf16.mxu1 %v1988_v1  ;;  %v1991_v3 = vld [vmem:[#allocation5 + $0x14] ss:$8 sps:$4 sm:$0xff]   ;;  %s1881_s11 = sshll.u32 %s2170_s15, 9 }
  0x72   : > { %238 = vst [vmem:[%s2371_s5] sm:$0xff] %v2186_v0  ;;  %239 = vst [vmem:[%s2371_s5 + $0x8] sm:$0xff] %v2186_v0  ;;  %637 = vmatpush1.bf16.msra.mxu0 %v1990_v2  ;;  %1900 = vmatpush1.bf16.msra.mxu1 %v1990_v2  ;;  %v1993_v4 = vld [vmem:[#allocation5 + $0x10] ss:$8 sps:$4 sm:$0xff]   ;;  %v1994_v5 = vld [vmem:[#allocation5 + $0x24] ss:$8 sps:$4 sm:$0xff]   ;;  %s2517_s24 = sadd.s32 512, %s1881_s11 }
  0x73   : > { %638 = vmatprep.subr.bf16.mxu0 %v1991_v3  ;;  %1885 = vmatprep.subr.bf16.mxu1 %v1991_v3  ;;  %v1996_v6 = vld [vmem:[#allocation5 + $0x20] ss:$8 sps:$4 sm:$0xff]   ;;  %v1997_v7 = vld [vmem:[#allocation5 + $0x34] ss:$8 sps:$4 sm:$0xff]   ;;  %v1999_v8 = vld [vmem:[#allocation5 + $0x30] ss:$8 sps:$4 sm:$0xff]  }
  0x74   : > { %v2000_v9 = vld [vmem:[#allocation5 + $0x44] ss:$8 sps:$4 sm:$0xff]   ;;  %v2002_v10 = vld [vmem:[#allocation5 + $0x40] ss:$8 sps:$4 sm:$0xff]   ;;  %v2003_v11 = vld [vmem:[#allocation5 + $0x54] ss:$8 sps:$4 sm:$0xff]  }
  0x75   : > { %v2005_v12 = vld [vmem:[#allocation5 + $0x50] ss:$8 sps:$4 sm:$0xff]   ;;  %v2006_v13 = vld [vmem:[#allocation5 + $0x64] ss:$8 sps:$4 sm:$0xff]   ;;  %v2008_v19 = vld [vmem:[#allocation5 + $0x60] ss:$8 sps:$4 sm:$0xff]  }
  0x76   : > { %639 = vmatpush1.bf16.msra.mxu0 %v1993_v4  ;;  %1901 = vmatpush1.bf16.msra.mxu1 %v1993_v4  ;;  %v241_v14 = vld [vmem:[%s2360_s4 + $0x8] sm:$0xff]  ;;  %v243_v15 = vld [vmem:[%s2360_s4 + $0x18] sm:$0xff]  ;;  %v240_v39 = vld [vmem:[%s2360_s4] sm:$0xff]  ;;  %p1870_p10 = scmp.gt.s32.totalorder %s2517_s24, 1000 }
  0x77   : > { %640 = vmatprep.subr.bf16.mxu0 %v1994_v5  ;;  %1886 = vmatprep.subr.bf16.mxu1 %v1994_v5  ;;  %v369_v16 = vpack.c.bf16 %v243_v15, %v241_v14  ;;  %v305_v17 = vld [vmem:[%s2360_s4 + $0x208] sm:$0xff]  ;;  %v307_v18 = vld [vmem:[%s2360_s4 + $0x218] sm:$0xff]  ;;  %v242_v40 = vld [vmem:[%s2360_s4 + $0x10] sm:$0xff] }
  0x78   : > { %v401_v20 = vpack.c.bf16 %v307_v18, %v305_v17  ;;  %v2009_v21 = vld [vmem:[#allocation5 + $0x74] ss:$8 sps:$4 sm:$0xff]   ;;  %v2011_v22 = vld [vmem:[#allocation5 + $0x70] ss:$8 sps:$4 sm:$0xff]   ;;  %v2012_v23 = vld [vmem:[#allocation5 + $0x84] ss:$8 sps:$4 sm:$0xff]   ;;  %v368_v47 = vpack.c.bf16 %v242_v40, %v240_v39 }
  0x79   : > { %668 = vmatprep.mubr.bf16.mxu0 %v369_v16  ;;  %v2014_v24 = vld [vmem:[#allocation5 + $0x80] ss:$8 sps:$4 sm:$0xff]   ;;  %v2015_v25 = vld [vmem:[#allocation5 + $0x94] ss:$8 sps:$4 sm:$0xff]   ;;  %v2017_v26 = vld [vmem:[#allocation5 + $0x90] ss:$8 sps:$4 sm:$0xff]  }
  0x7a   : > { %641 = vmatpush1.bf16.msra.mxu0 %v1996_v6  ;;  %1902 = vmatpush1.bf16.msra.mxu1 %v1996_v6  ;;  %v2018_v27 = vld [vmem:[#allocation5 + $0xa4] ss:$8 sps:$4 sm:$0xff]   ;;  %v2020_v28 = vld [vmem:[#allocation5 + $0xa0] ss:$8 sps:$4 sm:$0xff]   ;;  %v2021_v29 = vld [vmem:[#allocation5 + $0xb4] ss:$8 sps:$4 sm:$0xff]  }
  0x7b   : > { %642 = vmatprep.subr.bf16.mxu0 %v1997_v7  ;;  %1887 = vmatprep.subr.bf16.mxu1 %v1997_v7  ;;  %v2023_v30 = vld [vmem:[#allocation5 + $0xb0] ss:$8 sps:$4 sm:$0xff]   ;;  %v2024_v31 = vld [vmem:[#allocation5 + $0xc4] ss:$8 sps:$4 sm:$0xff]   ;;  %v2026_v32 = vld [vmem:[#allocation5 + $0xc0] ss:$8 sps:$4 sm:$0xff]  }
  0x7c   : > { %828 = vmatprep.mubr.bf16.mxu1 %v401_v20  ;;  %v2027_v33 = vld [vmem:[#allocation5 + $0xd4] ss:$8 sps:$4 sm:$0xff]   ;;  %v2029_v34 = vld [vmem:[#allocation5 + $0xd0] ss:$8 sps:$4 sm:$0xff]   ;;  %v2030_v35 = vld [vmem:[#allocation5 + $0xe4] ss:$8 sps:$4 sm:$0xff]  }
  0x7d   : > { %v2032_v36 = vld [vmem:[#allocation5 + $0xe0] ss:$8 sps:$4 sm:$0xff]   ;;  %v2033_v37 = vld [vmem:[#allocation5 + $0xf4] ss:$8 sps:$4 sm:$0xff]   ;;  %v2035_v38 = vld [vmem:[#allocation5 + $0xf0] ss:$8 sps:$4 sm:$0xff]  }
  0x7e   : > { %643 = vmatpush1.bf16.msra.mxu0 %v1999_v8  ;;  %1903 = vmatpush1.bf16.msra.mxu1 %v1999_v8  ;;  %v304_v41 = vld [vmem:[%s2360_s4 + $0x200] sm:$0xff]  ;;  %v306_v42 = vld [vmem:[%s2360_s4 + $0x210] sm:$0xff]  ;;  %v245_v43 = vld [vmem:[%s2360_s4 + $0x28] sm:$0xff] }
  0x7f   : > { %644 = vmatprep.subr.bf16.mxu0 %v2000_v9  ;;  %1888 = vmatprep.subr.bf16.mxu1 %v2000_v9  ;;  %v247_v44 = vld [vmem:[%s2360_s4 + $0x38] sm:$0xff]  ;;  %v309_v45 = vld [vmem:[%s2360_s4 + $0x228] sm:$0xff]  ;;  %v400_v48 = vpack.c.bf16 %v306_v42, %v304_v41  ;;  %v244_v51 = vld [vmem:[%s2360_s4 + $0x20] sm:$0xff] }
  0x80   : > { %v311_v46 = vld [vmem:[%s2360_s4 + $0x238] sm:$0xff]  ;;  %v371_v49 = vpack.c.bf16 %v247_v44, %v245_v43  ;;  %v246_v52 = vld [vmem:[%s2360_s4 + $0x30] sm:$0xff]  ;;  %v308_v53 = vld [vmem:[%s2360_s4 + $0x220] sm:$0xff] }
  0x81   : > { %v403_v50 = vpack.c.bf16 %v311_v46, %v309_v45  ;;  %v310_v54 = vld [vmem:[%s2360_s4 + $0x230] sm:$0xff]  ;;  %v249_v55 = vld [vmem:[%s2360_s4 + $0x48] sm:$0xff]  ;;  %v251_v56 = vld [vmem:[%s2360_s4 + $0x58] sm:$0xff]  ;;  %v370_v59 = vpack.c.bf16 %v246_v52, %v244_v51 }
  0x82   : > { %645 = vmatpush1.bf16.msra.mxu0 %v2002_v10  ;;  %1904 = vmatpush1.bf16.msra.mxu1 %v2002_v10  ;;  %v313_v57 = vld [vmem:[%s2360_s4 + $0x248] sm:$0xff]  ;;  %v315_v58 = vld [vmem:[%s2360_s4 + $0x258] sm:$0xff]  ;;  %v402_v60 = vpack.c.bf16 %v310_v54, %v308_v53  ;;  %v373_v61 = vpack.c.bf16 %v251_v56, %v249_v55  ;;  %v248_v63 = vld [vmem:[%s2360_s4 + $0x40] sm:$0xff] }
  0x83   : > { %646 = vmatprep.subr.bf16.mxu0 %v2003_v11  ;;  %1889 = vmatprep.subr.bf16.mxu1 %v2003_v11  ;;  %v405_v62 = vpack.c.bf16 %v315_v58, %v313_v57  ;;  %v250_v0 = vld [vmem:[%s2360_s4 + $0x50] sm:$0xff]  ;;  %v312_v1 = vld [vmem:[%s2360_s4 + $0x240] sm:$0xff]  ;;  %v253_v3 = vld [vmem:[%s2360_s4 + $0x68] sm:$0xff] }
  0x84   : > { %v314_v2 = vld [vmem:[%s2360_s4 + $0x250] sm:$0xff]  ;;  %v255_v4 = vld [vmem:[%s2360_s4 + $0x78] sm:$0xff]  ;;  %v317_v5 = vld [vmem:[%s2360_s4 + $0x268] sm:$0xff]  ;;  %v372_v7 = vpack.c.bf16 %v250_v0, %v248_v63 }
  0x85   : > { %v319_v6 = vld [vmem:[%s2360_s4 + $0x278] sm:$0xff]  ;;  %v404_v8 = vpack.c.bf16 %v314_v2, %v312_v1  ;;  %v375_v9 = vpack.c.bf16 %v255_v4, %v253_v3  ;;  %v252_v11 = vld [vmem:[%s2360_s4 + $0x60] sm:$0xff]  ;;  %v318_v14 = vld [vmem:[%s2360_s4 + $0x270] sm:$0xff] }
  0x86   : > { %647 = vmatpush1.bf16.msra.mxu0 %v2005_v12  ;;  %1905 = vmatpush1.bf16.msra.mxu1 %v2005_v12  ;;  %v407_v10 = vpack.c.bf16 %v319_v6, %v317_v5  ;;  %v254_v12 = vld [vmem:[%s2360_s4 + $0x70] sm:$0xff]  ;;  %v257_v15 = vld [vmem:[%s2360_s4 + $0x88] sm:$0xff]  ;;  %v259_v16 = vld [vmem:[%s2360_s4 + $0x98] sm:$0xff] }
  0x87   : > { %648 = vmatprep.subr.bf16.mxu0 %v2006_v13  ;;  %1890 = vmatprep.subr.bf16.mxu1 %v2006_v13  ;;  %v316_v13 = vld [vmem:[%s2360_s4 + $0x260] sm:$0xff]  ;;  %v321_v17 = vld [vmem:[%s2360_s4 + $0x288] sm:$0xff]  ;;  %v323_v18 = vld [vmem:[%s2360_s4 + $0x298] sm:$0xff] }
  0x88   : > { %v406_v20 = vpack.c.bf16 %v318_v14, %v316_v13  ;;  %v265_v39 = vld [vmem:[%s2360_s4 + $0xc8] sm:$0xff]  ;;  %v267_v40 = vld [vmem:[%s2360_s4 + $0xd8] sm:$0xff] }
  0x89   : > { %v329_v41 = vld [vmem:[%s2360_s4 + $0x2c8] sm:$0xff]  ;;  %v331_v42 = vld [vmem:[%s2360_s4 + $0x2d8] sm:$0xff]  ;;  %v381_v45 = vpack.c.bf16 %v267_v40, %v265_v39 }
  0x8a   : > { %649 = vmatpush1.bf16.msra.mxu0 %v2008_v19  ;;  %1906 = vmatpush1.bf16.msra.mxu1 %v2008_v19  ;;  %v374_v19 = vpack.c.bf16 %v254_v12, %v252_v11  ;;  %v413_v46 = vpack.c.bf16 %v331_v42, %v329_v41  ;;  %v269_v51 = vld [vmem:[%s2360_s4 + $0xe8] sm:$0xff]  ;;  %v271_v52 = vld [vmem:[%s2360_s4 + $0xf8] sm:$0xff] }
  0x8b   : > { %650 = vmatprep.subr.bf16.mxu0 %v2009_v21  ;;  %1891 = vmatprep.subr.bf16.mxu1 %v2009_v21  ;;  %v377_v21 = vpack.c.bf16 %v259_v16, %v257_v15  ;;  %v333_v53 = vld [vmem:[%s2360_s4 + $0x2e8] sm:$0xff]  ;;  %v335_v54 = vld [vmem:[%s2360_s4 + $0x2f8] sm:$0xff]  ;;  %v383_v57 = vpack.c.bf16 %v271_v52, %v269_v51 }
  0x8c   : > { %v415_v58 = vpack.c.bf16 %v335_v54, %v333_v53  ;;  %v273_v63 = vld [vmem:[%s2360_s4 + $0x108] sm:$0xff]  ;;  %v275_v0 = vld [vmem:[%s2360_s4 + $0x118] sm:$0xff] }
  0x8d   : > { %v337_v1 = vld [vmem:[%s2360_s4 + $0x308] sm:$0xff]  ;;  %v339_v2 = vld [vmem:[%s2360_s4 + $0x318] sm:$0xff]  ;;  %v385_v5 = vpack.c.bf16 %v275_v0, %v273_v63 }
  0x8e   : > { %651 = vmatpush1.bf16.msra.mxu0 %v2011_v22  ;;  %1907 = vmatpush1.bf16.msra.mxu1 %v2011_v22  ;;  %v409_v22 = vpack.c.bf16 %v323_v18, %v321_v17  ;;  %v417_v6 = vpack.c.bf16 %v339_v2, %v337_v1  ;;  %v277_v11 = vld [vmem:[%s2360_s4 + $0x128] sm:$0xff]  ;;  %v279_v12 = vld [vmem:[%s2360_s4 + $0x138] sm:$0xff] }
  0x8f   : > { %652 = vmatprep.subr.bf16.mxu0 %v2012_v23  ;;  %1892 = vmatprep.subr.bf16.mxu1 %v2012_v23  ;;  %v256_v23 = vld [vmem:[%s2360_s4 + $0x80] sm:$0xff]  ;;  %v341_v13 = vld [vmem:[%s2360_s4 + $0x328] sm:$0xff]  ;;  %v343_v14 = vld [vmem:[%s2360_s4 + $0x338] sm:$0xff]  ;;  %v387_v17 = vpack.c.bf16 %v279_v12, %v277_v11 }
  0x90   : > { %v419_v18 = vpack.c.bf16 %v343_v14, %v341_v13 }
  0x92   : > { %653 = vmatpush1.bf16.msra.mxu0 %v2014_v24  ;;  %1908 = vmatpush1.bf16.msra.mxu1 %v2014_v24  ;;  %v258_v24 = vld [vmem:[%s2360_s4 + $0x90] sm:$0xff] }
  0x93   : > { %654 = vmatprep.subr.bf16.mxu0 %v2015_v25  ;;  %1893 = vmatprep.subr.bf16.mxu1 %v2015_v25  ;;  %v320_v25 = vld [vmem:[%s2360_s4 + $0x280] sm:$0xff] }
  0x96   : > { %655 = vmatpush1.bf16.msra.mxu0 %v2017_v26  ;;  %1909 = vmatpush1.bf16.msra.mxu1 %v2017_v26  ;;  %v322_v26 = vld [vmem:[%s2360_s4 + $0x290] sm:$0xff] }
  0x97   : > { %656 = vmatprep.subr.bf16.mxu0 %v2018_v27  ;;  %1894 = vmatprep.subr.bf16.mxu1 %v2018_v27  ;;  %v261_v27 = vld [vmem:[%s2360_s4 + $0xa8] sm:$0xff] }
  0x9a   : > { %657 = vmatpush1.bf16.msra.mxu0 %v2020_v28  ;;  %1910 = vmatpush1.bf16.msra.mxu1 %v2020_v28  ;;  %v263_v28 = vld [vmem:[%s2360_s4 + $0xb8] sm:$0xff] }
  0x9b   : > { %658 = vmatprep.subr.bf16.mxu0 %v2021_v29  ;;  %1895 = vmatprep.subr.bf16.mxu1 %v2021_v29  ;;  %v325_v29 = vld [vmem:[%s2360_s4 + $0x2a8] sm:$0xff] }
  0x9e   : > { %659 = vmatpush1.bf16.msra.mxu0 %v2023_v30  ;;  %1911 = vmatpush1.bf16.msra.mxu1 %v2023_v30  ;;  %v327_v30 = vld [vmem:[%s2360_s4 + $0x2b8] sm:$0xff] }
  0x9f   : > { %660 = vmatprep.subr.bf16.mxu0 %v2024_v31  ;;  %1896 = vmatprep.subr.bf16.mxu1 %v2024_v31  ;;  %v376_v31 = vpack.c.bf16 %v258_v24, %v256_v23  ;;  %v281_v23 = vld [vmem:[%s2360_s4 + $0x148] sm:$0xff]  ;;  %v283_v24 = vld [vmem:[%s2360_s4 + $0x158] sm:$0xff] }
  0xa2   : > { %661 = vmatpush1.bf16.msra.mxu0 %v2026_v32  ;;  %1912 = vmatpush1.bf16.msra.mxu1 %v2026_v32  ;;  %v408_v32 = vpack.c.bf16 %v322_v26, %v320_v25  ;;  %v345_v25 = vld [vmem:[%s2360_s4 + $0x348] sm:$0xff]  ;;  %v347_v26 = vld [vmem:[%s2360_s4 + $0x358] sm:$0xff] }
  0xa3   : > { %662 = vmatprep.subr.bf16.mxu0 %v2027_v33  ;;  %1897 = vmatprep.subr.bf16.mxu1 %v2027_v33  ;;  %v379_v33 = vpack.c.bf16 %v263_v28, %v261_v27 }
  0xa6   : > { %663 = vmatpush1.bf16.msra.mxu0 %v2029_v34  ;;  %1913 = vmatpush1.bf16.msra.mxu1 %v2029_v34  ;;  %v411_v34 = vpack.c.bf16 %v327_v30, %v325_v29  ;;  %v389_v29 = vpack.c.bf16 %v283_v24, %v281_v23  ;;  %v421_v30 = vpack.c.bf16 %v347_v26, %v345_v25 }
  0xa7   : > { %664 = vmatprep.subr.bf16.mxu0 %v2030_v35  ;;  %1898 = vmatprep.subr.bf16.mxu1 %v2030_v35  ;;  %v260_v35 = vld [vmem:[%s2360_s4 + $0xa0] sm:$0xff] }
  0xaa   : > { %665 = vmatpush1.bf16.msra.mxu0 %v2032_v36  ;;  %1914 = vmatpush1.bf16.msra.mxu1 %v2032_v36  ;;  %v262_v36 = vld [vmem:[%s2360_s4 + $0xb0] sm:$0xff] }
  0xab   : > { %666 = vmatprep.subr.bf16.mxu0 %v2033_v37  ;;  %1899 = vmatprep.subr.bf16.mxu1 %v2033_v37  ;;  %v324_v37 = vld [vmem:[%s2360_s4 + $0x2a0] sm:$0xff]  ;;  %v378_v43 = vpack.c.bf16 %v262_v36, %v260_v35  ;;  %v285_v35 = vld [vmem:[%s2360_s4 + $0x168] sm:$0xff]  ;;  %v287_v36 = vld [vmem:[%s2360_s4 + $0x178] sm:$0xff] }
  0xac   : > { %v391_v41 = vpack.c.bf16 %v287_v36, %v285_v35  ;;  %v464_v36 = vld [vmem:[%s3735_s2] sm:$0x3] }
  0xae   : > { %667 = vmatpush1.bf16.msra.mxu0 %v2035_v38  ;;  %1915 = vmatpush1.bf16.msra.mxu1 %v2035_v38  ;;  %v326_v38 = vld [vmem:[%s2360_s4 + $0x2b0] sm:$0xff] }
  0xaf   : > { %v410_v44 = vpack.c.bf16 %v326_v38, %v324_v37  ;;  %v349_v37 = vld [vmem:[%s2360_s4 + $0x368] sm:$0xff]  ;;  %v351_v38 = vld [vmem:[%s2360_s4 + $0x378] sm:$0xff] }
  0xb0   : > { %v423_v42 = vpack.c.bf16 %v351_v38, %v349_v37 }
  0xb1   : > { %669 = vmatmul.mubr.bf16.vlgmr.msra.gmra.mrb[0].mxu0 %v368_v47  ;;  %829 = vmatmul.mubr.bf16.vlgmr.msra.gmra.mrb[0].mxu1 %v400_v48  ;;  %v264_v47 = vld [vmem:[%s2360_s4 + $0xc0] sm:$0xff]  ;;  %v266_v48 = vld [vmem:[%s2360_s4 + $0xd0] sm:$0xff] }
  0xb2   : > { %678 = vmatprep.mubr.bf16.mxu0 %v371_v49  ;;  %838 = vmatprep.mubr.bf16.mxu1 %v403_v50  ;;  %v328_v49 = vld [vmem:[%s2360_s4 + $0x2c0] sm:$0xff]  ;;  %v330_v50 = vld [vmem:[%s2360_s4 + $0x2d0] sm:$0xff]  ;;  %v380_v55 = vpack.c.bf16 %v266_v48, %v264_v47  ;;  %v289_v47 = vld [vmem:[%s2360_s4 + $0x188] sm:$0xff] }
  0xb3   : > { %v412_v56 = vpack.c.bf16 %v330_v50, %v328_v49  ;;  %v291_v48 = vld [vmem:[%s2360_s4 + $0x198] sm:$0xff]  ;;  %v353_v49 = vld [vmem:[%s2360_s4 + $0x388] sm:$0xff] }
  0xb4   : > { %v355_v50 = vld [vmem:[%s2360_s4 + $0x398] sm:$0xff]  ;;  %v393_v53 = vpack.c.bf16 %v291_v48, %v289_v47 }
  0xb5   : > { %v425_v54 = vpack.c.bf16 %v355_v50, %v353_v49 }
  0xb9   : > { %679 = vmatmul.mubr.bf16.gmra.mrb[4].mxu0 %v370_v59  ;;  %839 = vmatmul.mubr.bf16.gmra.mrb[4].mxu1 %v402_v60  ;;  %v268_v59 = vld [vmem:[%s2360_s4 + $0xe0] sm:$0xff]  ;;  %v270_v60 = vld [vmem:[%s2360_s4 + $0xf0] sm:$0xff] }
  0xba   : > { %688 = vmatprep.mubr.bf16.mxu0 %v373_v61  ;;  %848 = vmatprep.mubr.bf16.mxu1 %v405_v62  ;;  %v332_v61 = vld [vmem:[%s2360_s4 + $0x2e0] sm:$0xff]  ;;  %v334_v62 = vld [vmem:[%s2360_s4 + $0x2f0] sm:$0xff]  ;;  %v382_v3 = vpack.c.bf16 %v270_v60, %v268_v59  ;;  %v293_v59 = vld [vmem:[%s2360_s4 + $0x1a8] sm:$0xff] }
  0xbb   : > { %v414_v4 = vpack.c.bf16 %v334_v62, %v332_v61  ;;  %v295_v60 = vld [vmem:[%s2360_s4 + $0x1b8] sm:$0xff]  ;;  %v357_v61 = vld [vmem:[%s2360_s4 + $0x3a8] sm:$0xff] }
  0xbc   : > { %v359_v62 = vld [vmem:[%s2360_s4 + $0x3b8] sm:$0xff]  ;;  %v395_v1 = vpack.c.bf16 %v295_v60, %v293_v59 }
  0xbd   : > { %v427_v2 = vpack.c.bf16 %v359_v62, %v357_v61 }
  0xc1   : > { %689 = vmatmul.mubr.bf16.gmra.mrb[8].mxu0 %v372_v7  ;;  %849 = vmatmul.mubr.bf16.gmra.mrb[8].mxu1 %v404_v8  ;;  %v272_v7 = vld [vmem:[%s2360_s4 + $0x100] sm:$0xff]  ;;  %v274_v8 = vld [vmem:[%s2360_s4 + $0x110] sm:$0xff] }
  0xc2   : > { %698 = vmatprep.mubr.bf16.mxu0 %v375_v9  ;;  %858 = vmatprep.mubr.bf16.mxu1 %v407_v10  ;;  %v336_v9 = vld [vmem:[%s2360_s4 + $0x300] sm:$0xff]  ;;  %v338_v10 = vld [vmem:[%s2360_s4 + $0x310] sm:$0xff]  ;;  %v384_v15 = vpack.c.bf16 %v274_v8, %v272_v7  ;;  %v297_v7 = vld [vmem:[%s2360_s4 + $0x1c8] sm:$0xff] }
  0xc3   : > { %v416_v16 = vpack.c.bf16 %v338_v10, %v336_v9  ;;  %v299_v8 = vld [vmem:[%s2360_s4 + $0x1d8] sm:$0xff]  ;;  %v361_v9 = vld [vmem:[%s2360_s4 + $0x3c8] sm:$0xff] }
  0xc4   : > { %v363_v10 = vld [vmem:[%s2360_s4 + $0x3d8] sm:$0xff]  ;;  %v397_v13 = vpack.c.bf16 %v299_v8, %v297_v7 }
  0xc5   : > { %v429_v14 = vpack.c.bf16 %v363_v10, %v361_v9 }
  0xc9   : > { %699 = vmatmul.mubr.bf16.gmra.mrb[12].mxu0 %v374_v19  ;;  %859 = vmatmul.mubr.bf16.gmra.mrb[12].mxu1 %v406_v20  ;;  %v276_v19 = vld [vmem:[%s2360_s4 + $0x120] sm:$0xff]  ;;  %v278_v20 = vld [vmem:[%s2360_s4 + $0x130] sm:$0xff] }
  0xca   : > { %708 = vmatprep.mubr.bf16.mxu0 %v377_v21  ;;  %868 = vmatprep.mubr.bf16.mxu1 %v409_v22  ;;  %v340_v21 = vld [vmem:[%s2360_s4 + $0x320] sm:$0xff]  ;;  %v342_v22 = vld [vmem:[%s2360_s4 + $0x330] sm:$0xff]  ;;  %v386_v27 = vpack.c.bf16 %v278_v20, %v276_v19  ;;  %v301_v19 = vld [vmem:[%s2360_s4 + $0x1e8] sm:$0xff] }
  0xcb   : > { %v418_v28 = vpack.c.bf16 %v342_v22, %v340_v21  ;;  %v303_v20 = vld [vmem:[%s2360_s4 + $0x1f8] sm:$0xff]  ;;  %v365_v21 = vld [vmem:[%s2360_s4 + $0x3e8] sm:$0xff] }
  0xcc   : > { %v367_v22 = vld [vmem:[%s2360_s4 + $0x3f8] sm:$0xff]  ;;  %v399_v25 = vpack.c.bf16 %v303_v20, %v301_v19 }
  0xcd   : > { %v431_v26 = vpack.c.bf16 %v367_v22, %v365_v21 }
  0xd1   : > { %709 = vmatmul.mubr.bf16.gmra.mrb[16].mxu0 %v376_v31  ;;  %869 = vmatmul.mubr.bf16.gmra.mrb[16].mxu1 %v408_v32  ;;  %v280_v31 = vld [vmem:[%s2360_s4 + $0x140] sm:$0xff]  ;;  %v282_v32 = vld [vmem:[%s2360_s4 + $0x150] sm:$0xff] }
  0xd2   : > { %718 = vmatprep.mubr.bf16.mxu0 %v379_v33  ;;  %878 = vmatprep.mubr.bf16.mxu1 %v411_v34  ;;  %v344_v33 = vld [vmem:[%s2360_s4 + $0x340] sm:$0xff]  ;;  %v346_v34 = vld [vmem:[%s2360_s4 + $0x350] sm:$0xff]  ;;  %v388_v39 = vpack.c.bf16 %v282_v32, %v280_v31 }
  0xd3   : > { %v420_v40 = vpack.c.bf16 %v346_v34, %v344_v33  ;;  %v466_v33 = vlaneseq }
  0xd5   : > { %v2503_v34 = vshrl.u32 %v466_v33, 7 }
  0xd7   : > { %3842 = vst [vmem:[#allocation11_spill] sm:$0xff] %v2503_v34  ;;  %v468_v35 = vsub.s32 0, %v2503_v34  ;;  %v472_v37 = vsub.s32 1, %v2503_v34 }
  0xd9   : > { %719 = vmatmul.mubr.bf16.gmra.mrb[20].mxu0 %v378_v43  ;;  %879 = vmatmul.mubr.bf16.gmra.mrb[20].mxu1 %v410_v44  ;;  %v284_v43 = vld [vmem:[%s2360_s4 + $0x160] sm:$0xff]  ;;  %v286_v44 = vld [vmem:[%s2360_s4 + $0x170] sm:$0xff]  ;;  %v2510_v38 = vrot.slane %v464_v36, %v468_v35 }
  0xda   : > { %728 = vmatprep.mubr.bf16.mxu0 %v381_v45  ;;  %888 = vmatprep.mubr.bf16.mxu1 %v413_v46  ;;  %v348_v45 = vld [vmem:[%s2360_s4 + $0x360] sm:$0xff]  ;;  %v350_v46 = vld [vmem:[%s2360_s4 + $0x370] sm:$0xff]  ;;  %v390_v51 = vpack.c.bf16 %v286_v44, %v284_v43 }
  0xdb   : > { %v422_v52 = vpack.c.bf16 %v350_v46, %v348_v45 }
  0xe1   : > { %729 = vmatmul.mubr.bf16.gmra.mrb[24].mxu0 %v380_v55  ;;  %889 = vmatmul.mubr.bf16.gmra.mrb[24].mxu1 %v412_v56  ;;  %v288_v55 = vld [vmem:[%s2360_s4 + $0x180] sm:$0xff]  ;;  %v290_v56 = vld [vmem:[%s2360_s4 + $0x190] sm:$0xff] }
  0xe2   : > { %738 = vmatprep.mubr.bf16.mxu0 %v383_v57  ;;  %898 = vmatprep.mubr.bf16.mxu1 %v415_v58  ;;  %v352_v57 = vld [vmem:[%s2360_s4 + $0x380] sm:$0xff]  ;;  %v354_v58 = vld [vmem:[%s2360_s4 + $0x390] sm:$0xff]  ;;  %v392_v63 = vpack.c.bf16 %v290_v56, %v288_v55 }
  0xe3   : > { %v424_v0 = vpack.c.bf16 %v354_v58, %v352_v57 }
  0xe9   : > { %739 = vmatmul.mubr.bf16.gmra.mrb[28].mxu0 %v382_v3  ;;  %899 = vmatmul.mubr.bf16.gmra.mrb[28].mxu1 %v414_v4  ;;  %v292_v3 = vld [vmem:[%s2360_s4 + $0x1a0] sm:$0xff]  ;;  %v294_v4 = vld [vmem:[%s2360_s4 + $0x1b0] sm:$0xff] }
  0xea   : > { %748 = vmatprep.mubr.bf16.mxu0 %v385_v5  ;;  %908 = vmatprep.mubr.bf16.mxu1 %v417_v6  ;;  %v356_v5 = vld [vmem:[%s2360_s4 + $0x3a0] sm:$0xff]  ;;  %v358_v6 = vld [vmem:[%s2360_s4 + $0x3b0] sm:$0xff]  ;;  %v394_v11 = vpack.c.bf16 %v294_v4, %v292_v3 }
  0xeb   : > { %v426_v12 = vpack.c.bf16 %v358_v6, %v356_v5 }
  0xf1   : > { %749 = vmatmul.mubr.bf16.gmra.mrb[32].mxu0 %v384_v15  ;;  %909 = vmatmul.mubr.bf16.gmra.mrb[32].mxu1 %v416_v16  ;;  %v296_v15 = vld [vmem:[%s2360_s4 + $0x1c0] sm:$0xff]  ;;  %v298_v16 = vld [vmem:[%s2360_s4 + $0x1d0] sm:$0xff] }
  0xf2   : > { %758 = vmatprep.mubr.bf16.mxu0 %v387_v17  ;;  %918 = vmatprep.mubr.bf16.mxu1 %v419_v18  ;;  %v360_v17 = vld [vmem:[%s2360_s4 + $0x3c0] sm:$0xff]  ;;  %v362_v18 = vld [vmem:[%s2360_s4 + $0x3d0] sm:$0xff]  ;;  %v396_v23 = vpack.c.bf16 %v298_v16, %v296_v15 }
  0xf3   : > { %v428_v24 = vpack.c.bf16 %v362_v18, %v360_v17 }
  0xf9   : > { %759 = vmatmul.mubr.bf16.gmra.mrb[36].mxu0 %v386_v27  ;;  %919 = vmatmul.mubr.bf16.gmra.mrb[36].mxu1 %v418_v28  ;;  %v300_v27 = vld [vmem:[%s2360_s4 + $0x1e0] sm:$0xff]  ;;  %v302_v28 = vld [vmem:[%s2360_s4 + $0x1f0] sm:$0xff] }
  0xfa   : > { %768 = vmatprep.mubr.bf16.mxu0 %v389_v29  ;;  %928 = vmatprep.mubr.bf16.mxu1 %v421_v30  ;;  %v364_v29 = vld [vmem:[%s2360_s4 + $0x3e0] sm:$0xff]  ;;  %v366_v30 = vld [vmem:[%s2360_s4 + $0x3f0] sm:$0xff]  ;;  %v398_v31 = vpack.c.bf16 %v302_v28, %v300_v27 }
  0xfb   : > { %v430_v32 = vpack.c.bf16 %v366_v30, %v364_v29 }
 0x101   : > { %769 = vmatmul.mubr.bf16.gmra.mrb[40].mxu0 %v388_v39  ;;  %929 = vmatmul.mubr.bf16.gmra.mrb[40].mxu1 %v420_v40  ;;  %v2513_v39 = vrot.slane %v464_v36, %v472_v37 }
 0x102   : > { %778 = vmatprep.mubr.bf16.mxu0 %v391_v41  ;;  %938 = vmatprep.mubr.bf16.mxu1 %v423_v42 }
 0x109   : > { %779 = vmatmul.mubr.bf16.gmra.mrb[44].mxu0 %v390_v51  ;;  %939 = vmatmul.mubr.bf16.gmra.mrb[44].mxu1 %v422_v52 }
 0x10a   : > { %788 = vmatprep.mubr.bf16.mxu0 %v393_v53  ;;  %948 = vmatprep.mubr.bf16.mxu1 %v425_v54 }
 0x111   : > { %789 = vmatmul.mubr.bf16.gmra.mrb[48].mxu0 %v392_v63  ;;  %949 = vmatmul.mubr.bf16.gmra.mrb[48].mxu1 %v424_v0 }
 0x112   : > { %798 = vmatprep.mubr.bf16.mxu0 %v395_v1  ;;  %958 = vmatprep.mubr.bf16.mxu1 %v427_v2 }
 0x119   : > { %799 = vmatmul.mubr.bf16.gmra.mrb[52].mxu0 %v394_v11  ;;  %959 = vmatmul.mubr.bf16.gmra.mrb[52].mxu1 %v426_v12 }
 0x11a   : > { %808 = vmatprep.mubr.bf16.mxu0 %v397_v13  ;;  %968 = vmatprep.mubr.bf16.mxu1 %v429_v14 }
 0x121   : > { %809 = vmatmul.mubr.bf16.gmra.mrb[56].mxu0 %v396_v23  ;;  %969 = vmatmul.mubr.bf16.gmra.mrb[56].mxu1 %v428_v24 }
 0x122   : > { %818 = vmatprep.mubr.bf16.mxu0 %v399_v25  ;;  %978 = vmatprep.mubr.bf16.mxu1 %v431_v26 }
 0x129   : > { %819 = vmatmul.mubr.bf16.gmra.mrb[60].mxu0 %v398_v31  ;;  %979 = vmatmul.mubr.bf16.gmra.mrb[60].mxu1 %v430_v32 }
 0x184   : > { %v670_v40 = vpop.f32.mrb[0].mxu0  ;;  %v830_v41 = vpop.f32.mrb[0].mxu1 }
 0x185   : > { %v2520_v42 = vadd.f32 %v670_v40, %v2510_v38  ;;  %v2523_v43 = vadd.f32 %v830_v41, %v2510_v38  ;;  %v672_v44 = vpop.f32.mrb[1].mxu0  ;;  %v832_v45 = vpop.f32.mrb[1].mxu1 }
 0x186   : > { %v2526_v46 = vadd.f32 %v672_v44, %v2513_v39  ;;  %v2529_v47 = vadd.f32 %v832_v45, %v2513_v39  ;;  %v674_v48 = vpop.f32.mrb[2].mxu0  ;;  %v834_v49 = vpop.f32.mrb[2].mxu1 }
 0x187   : > { %3843 = vst [vmem:[#allocation12_spill] sm:$0xff] %v2520_v42  ;;  %3844 = vst [vmem:[#allocation13_spill] sm:$0xff] %v2523_v43  ;;  %v2534_v52 = vadd.f32 %v674_v48, %v2510_v38  ;;  %v2537_v53 = vadd.f32 %v834_v49, %v2510_v38  ;;  %v676_v54 = vpop.f32.mrb[3].mxu0  ;;  %v836_v55 = vpop.f32.mrb[3].mxu1 }
 0x188   : > { %3845 = vst [vmem:[#allocation14_spill] sm:$0xff] %v2526_v46  ;;  %3846 = vst [vmem:[#allocation15_spill] sm:$0xff] %v2529_v47  ;;  %v2542_v58 = vadd.f32 %v676_v54, %v2513_v39  ;;  %v2545_v59 = vadd.f32 %v836_v55, %v2513_v39 }
 0x189   : > { %3847 = vst [vmem:[#allocation16_spill] sm:$0xff] %v2534_v52  ;;  %3848 = vst [vmem:[#allocation17_spill] sm:$0xff] %v2537_v53 }
 0x18a   : > { %3849 = vst [vmem:[#allocation18_spill] sm:$0xff] %v2545_v59 }
 0x18c   : > { %v680_v0 = vpop.f32.mrb[4].mxu0  ;;  %v840_v1 = vpop.f32.mrb[4].mxu1 }
 0x18d   : > { %v2552_v2 = vadd.f32 %v680_v0, %v2510_v38  ;;  %v2555_v3 = vadd.f32 %v840_v1, %v2510_v38  ;;  %v682_v4 = vpop.f32.mrb[5].mxu0  ;;  %v842_v5 = vpop.f32.mrb[5].mxu1 }
 0x18e   : > { %v2558_v6 = vadd.f32 %v682_v4, %v2513_v39  ;;  %v2561_v7 = vadd.f32 %v842_v5, %v2513_v39  ;;  %v684_v8 = vpop.f32.mrb[6].mxu0  ;;  %v844_v9 = vpop.f32.mrb[6].mxu1 }
 0x18f   : > { %3850 = vst [vmem:[#allocation19_spill] sm:$0xff] %v2555_v3  ;;  %v2566_v12 = vadd.f32 %v684_v8, %v2510_v38  ;;  %v2569_v13 = vadd.f32 %v844_v9, %v2510_v38  ;;  %v686_v14 = vpop.f32.mrb[7].mxu0  ;;  %v846_v15 = vpop.f32.mrb[7].mxu1 }
 0x190   : > { %3851 = vst [vmem:[#allocation20_spill] sm:$0xff] %v2561_v7  ;;  %v2574_v18 = vadd.f32 %v686_v14, %v2513_v39  ;;  %v2577_v19 = vadd.f32 %v846_v15, %v2513_v39 }
 0x191   : > { %3852 = vst [vmem:[#allocation21_spill] sm:$0xff] %v2569_v13 }
 0x192   : > { %3853 = vst [vmem:[#allocation22_spill] sm:$0xff] %v2577_v19 }
 0x194   : > { %v690_v24 = vpop.f32.mrb[8].mxu0  ;;  %v850_v25 = vpop.f32.mrb[8].mxu1 }
 0x195   : > { %v2584_v26 = vadd.f32 %v690_v24, %v2510_v38  ;;  %v2587_v27 = vadd.f32 %v850_v25, %v2510_v38  ;;  %v692_v28 = vpop.f32.mrb[9].mxu0  ;;  %v852_v29 = vpop.f32.mrb[9].mxu1 }
 0x196   : > { %v2590_v30 = vadd.f32 %v692_v28, %v2513_v39  ;;  %v2593_v31 = vadd.f32 %v852_v29, %v2513_v39  ;;  %v694_v32 = vpop.f32.mrb[10].mxu0  ;;  %v854_v33 = vpop.f32.mrb[10].mxu1 }
 0x197   : > { %3854 = vst [vmem:[#allocation23_spill] sm:$0xff] %v2587_v27  ;;  %v2598_v37 = vadd.f32 %v694_v32, %v2510_v38  ;;  %v2601_v40 = vadd.f32 %v854_v33, %v2510_v38  ;;  %v696_v41 = vpop.f32.mrb[11].mxu0  ;;  %v856_v44 = vpop.f32.mrb[11].mxu1 }
 0x198   : > { %3855 = vst [vmem:[#allocation24_spill] sm:$0xff] %v2593_v31  ;;  %v2606_v49 = vadd.f32 %v696_v41, %v2513_v39  ;;  %v2609_v54 = vadd.f32 %v856_v44, %v2513_v39 }
 0x199   : > { %3856 = vst [vmem:[#allocation25_spill] sm:$0xff] %v2601_v40 }
 0x19a   : > { %3857 = vst [vmem:[#allocation26_spill] sm:$0xff] %v2609_v54 }
 0x19c   : > { %v700_v5 = vpop.f32.mrb[12].mxu0  ;;  %v860_v8 = vpop.f32.mrb[12].mxu1 }
 0x19d   : > { %v2616_v9 = vadd.f32 %v700_v5, %v2510_v38  ;;  %v2619_v14 = vadd.f32 %v860_v8, %v2510_v38  ;;  %v702_v15 = vpop.f32.mrb[13].mxu0  ;;  %v862_v24 = vpop.f32.mrb[13].mxu1 }
 0x19e   : > { %v2622_v25 = vadd.f32 %v702_v15, %v2513_v39  ;;  %v2625_v28 = vadd.f32 %v862_v24, %v2513_v39  ;;  %v704_v29 = vpop.f32.mrb[14].mxu0  ;;  %v864_v32 = vpop.f32.mrb[14].mxu1 }
 0x19f   : > { %3858 = vst [vmem:[#allocation27_spill] sm:$0xff] %v2619_v14  ;;  %v2630_v44 = vadd.f32 %v704_v29, %v2510_v38  ;;  %v2633_v5 = vadd.f32 %v864_v32, %v2510_v38  ;;  %v706_v8 = vpop.f32.mrb[15].mxu0  ;;  %v866_v4 = vpop.f32.mrb[15].mxu1 }
 0x1a0   : > { %3859 = vst [vmem:[#allocation28_spill] sm:$0xff] %v2625_v28  ;;  %v2638_v24 = vadd.f32 %v706_v8, %v2513_v39  ;;  %v2641_v48 = vadd.f32 %v866_v4, %v2513_v39 }
 0x1a1   : > { %3860 = vst [vmem:[#allocation29_spill] sm:$0xff] %v2633_v5 }
 0x1a2   : > { %3861 = vst [vmem:[#allocation30_spill] sm:$0xff] %v2641_v48 }
 0x1a4   : > { %v710_v23 = vpop.f32.mrb[16].mxu0  ;;  %v870_v21 = vpop.f32.mrb[16].mxu1 }
 0x1a5   : > { %v2648_v17 = vadd.f32 %v710_v23, %v2510_v38  ;;  %v2651_v0 = vadd.f32 %v870_v21, %v2510_v38  ;;  %v712_v8 = vpop.f32.mrb[17].mxu0  ;;  %v872_v11 = vpop.f32.mrb[17].mxu1 }
 0x1a6   : > { %v2654_v4 = vadd.f32 %v712_v8, %v2513_v39  ;;  %v2657_v63 = vadd.f32 %v872_v11, %v2513_v39  ;;  %v714_v29 = vpop.f32.mrb[18].mxu0  ;;  %v874_v61 = vpop.f32.mrb[18].mxu1 }
 0x1a7   : > { %3862 = vst [vmem:[#allocation31_spill] sm:$0xff] %v2651_v0  ;;  %v2662_v23 = vadd.f32 %v714_v29, %v2510_v38  ;;  %v2665_v21 = vadd.f32 %v874_v61, %v2510_v38  ;;  %v716_v51 = vpop.f32.mrb[19].mxu0  ;;  %v876_v36 = vpop.f32.mrb[19].mxu1 }
 0x1a8   : > { %3863 = vst [vmem:[#allocation32_spill] sm:$0xff] %v2657_v63  ;;  %v2670_v11 = vadd.f32 %v716_v51, %v2513_v39  ;;  %v2673_v15 = vadd.f32 %v876_v36, %v2513_v39 }
 0x1a9   : > { %3864 = vst [vmem:[#allocation33_spill] sm:$0xff] %v2665_v21 }
 0x1aa   : > { %3865 = vst [vmem:[#allocation34_spill] sm:$0xff] %v2673_v15 }
 0x1ac   : > { %v720_v33 = vpop.f32.mrb[20].mxu0  ;;  %v880_v1 = vpop.f32.mrb[20].mxu1 }
 0x1ad   : > { %v2680_v8 = vadd.f32 %v720_v33, %v2510_v38  ;;  %v2683_v41 = vadd.f32 %v880_v1, %v2510_v38  ;;  %v722_v51 = vpop.f32.mrb[21].mxu0  ;;  %v882_v55 = vpop.f32.mrb[21].mxu1 }
 0x1ae   : > { %v2686_v36 = vadd.f32 %v722_v51, %v2513_v39  ;;  %v2689_v57 = vadd.f32 %v882_v55, %v2513_v39  ;;  %v724_v29 = vpop.f32.mrb[22].mxu0  ;;  %v884_v32 = vpop.f32.mrb[22].mxu1 }
 0x1af   : > { %3866 = vst [vmem:[#allocation35_spill] sm:$0xff] %v2683_v41  ;;  %v2694_v33 = vadd.f32 %v724_v29, %v2510_v38  ;;  %v2697_v1 = vadd.f32 %v884_v32, %v2510_v38  ;;  %v726_v35 = vpop.f32.mrb[23].mxu0  ;;  %v886_v22 = vpop.f32.mrb[23].mxu1 }
 0x1b0   : > { %3867 = vst [vmem:[#allocation36_spill] sm:$0xff] %v2689_v57  ;;  %v2702_v55 = vadd.f32 %v726_v35, %v2513_v39  ;;  %v2705_v16 = vadd.f32 %v886_v22, %v2513_v39 }
 0x1b1   : > { %3868 = vst [vmem:[#allocation37_spill] sm:$0xff] %v2697_v1 }
 0x1b2   : > { %3869 = vst [vmem:[#allocation38_spill] sm:$0xff] %v2705_v16 }
 0x1b4   : > { %v730_v10 = vpop.f32.mrb[24].mxu0  ;;  %v890_v62 = vpop.f32.mrb[24].mxu1 }
 0x1b5   : > { %v2712_v51 = vadd.f32 %v730_v10, %v2510_v38  ;;  %v2715_v20 = vadd.f32 %v890_v62, %v2510_v38  ;;  %v732_v35 = vpop.f32.mrb[25].mxu0  ;;  %v892_v56 = vpop.f32.mrb[25].mxu1 }
 0x1b6   : > { %v2718_v22 = vadd.f32 %v732_v35, %v2513_v39  ;;  %v2721_v45 = vadd.f32 %v892_v56, %v2513_v39  ;;  %v734_v29 = vpop.f32.mrb[26].mxu0  ;;  %v894_v61 = vpop.f32.mrb[26].mxu1 }
 0x1b7   : > { %3870 = vst [vmem:[#allocation39_spill] sm:$0xff] %v2715_v20  ;;  %v2726_v10 = vadd.f32 %v734_v29, %v2510_v38  ;;  %v2729_v62 = vadd.f32 %v894_v61, %v2510_v38  ;;  %v736_v50 = vpop.f32.mrb[27].mxu0  ;;  %v896_v34 = vpop.f32.mrb[27].mxu1 }
 0x1b8   : > { %3871 = vst [vmem:[#allocation40_spill] sm:$0xff] %v2721_v45  ;;  %v2734_v56 = vadd.f32 %v736_v50, %v2513_v39  ;;  %v2737_v1 = vadd.f32 %v896_v34, %v2513_v39 }
 0x1b9   : > { %3872 = vst [vmem:[#allocation41_spill] sm:$0xff] %v2729_v62 }
 0x1ba   : > { %3873 = vst [vmem:[#allocation42_spill] sm:$0xff] %v2737_v1 }
 0x1bc   : > { %v740_v20 = vpop.f32.mrb[28].mxu0  ;;  %v900_v57 = vpop.f32.mrb[28].mxu1 }
 0x1bd   : > { %v2744_v35 = vadd.f32 %v740_v20, %v2510_v38  ;;  %v2747_v16 = vadd.f32 %v900_v57, %v2510_v38  ;;  %v742_v50 = vpop.f32.mrb[29].mxu0  ;;  %v902_v45 = vpop.f32.mrb[29].mxu1 }
 0x1be   : > { %v2750_v34 = vadd.f32 %v742_v50, %v2513_v39  ;;  %v2753_v60 = vadd.f32 %v902_v45, %v2513_v39  ;;  %v744_v29 = vpop.f32.mrb[30].mxu0  ;;  %v904_v32 = vpop.f32.mrb[30].mxu1 }
 0x1bf   : > { %3874 = vst [vmem:[#allocation43_spill] sm:$0xff] %v2747_v16  ;;  %v2758_v20 = vadd.f32 %v744_v29, %v2510_v38  ;;  %v2761_v57 = vadd.f32 %v904_v32, %v2510_v38  ;;  %v746_v62 = vpop.f32.mrb[31].mxu0  ;;  %v906_v41 = vpop.f32.mrb[31].mxu1 }
 0x1c0   : > { %3875 = vst [vmem:[#allocation44_spill] sm:$0xff] %v2753_v60  ;;  %v2766_v45 = vadd.f32 %v746_v62, %v2513_v39  ;;  %v2769_v21 = vadd.f32 %v906_v41, %v2513_v39 }
 0x1c1   : > { %3876 = vst [vmem:[#allocation45_spill] sm:$0xff] %v2761_v57 }
 0x1c2   : > { %3877 = vst [vmem:[#allocation46_spill] sm:$0xff] %v2769_v21 }
 0x1c4   : > { %v750_v16 = vpop.f32.mrb[32].mxu0  ;;  %v910_v63 = vpop.f32.mrb[32].mxu1 }
 0x1c5   : > { %v2776_v50 = vadd.f32 %v750_v16, %v2510_v38  ;;  %v2779_v15 = vadd.f32 %v910_v63, %v2510_v38  ;;  %v752_v62 = vpop.f32.mrb[33].mxu0  ;;  %v912_v60 = vpop.f32.mrb[33].mxu1 }
 0x1c6   : > { %v2782_v41 = vadd.f32 %v752_v62, %v2513_v39  ;;  %v2785_v1 = vadd.f32 %v912_v60, %v2513_v39  ;;  %v754_v29 = vpop.f32.mrb[34].mxu0  ;;  %v914_v61 = vpop.f32.mrb[34].mxu1 }
 0x1c7   : > { %3878 = vst [vmem:[#allocation47_spill] sm:$0xff] %v2779_v15  ;;  %v2790_v16 = vadd.f32 %v754_v29, %v2510_v38  ;;  %v2793_v63 = vadd.f32 %v914_v61, %v2510_v38  ;;  %v756_v57 = vpop.f32.mrb[35].mxu0  ;;  %v916_v0 = vpop.f32.mrb[35].mxu1 }
 0x1c8   : > { %3879 = vst [vmem:[#allocation48_spill] sm:$0xff] %v2785_v1  ;;  %v2798_v60 = vadd.f32 %v756_v57, %v2513_v39  ;;  %v2801_v5 = vadd.f32 %v916_v0, %v2513_v39 }
 0x1c9   : > { %3880 = vst [vmem:[#allocation49_spill] sm:$0xff] %v2793_v63 }
 0x1ca   : > { %3881 = vst [vmem:[#allocation50_spill] sm:$0xff] %v2801_v5 }
 0x1cc   : > { %v760_v15 = vpop.f32.mrb[36].mxu0  ;;  %v920_v28 = vpop.f32.mrb[36].mxu1 }
 0x1cd   : > { %v2808_v62 = vadd.f32 %v760_v15, %v2510_v38  ;;  %v2811_v48 = vadd.f32 %v920_v28, %v2510_v38  ;;  %v762_v57 = vpop.f32.mrb[37].mxu0  ;;  %v922_v1 = vpop.f32.mrb[37].mxu1 }
 0x1ce   : > { %v2814_v0 = vadd.f32 %v762_v57, %v2513_v39  ;;  %v2817_v21 = vadd.f32 %v922_v1, %v2513_v39  ;;  %v764_v29 = vpop.f32.mrb[38].mxu0  ;;  %v924_v32 = vpop.f32.mrb[38].mxu1 }
 0x1cf   : > { %3882 = vst [vmem:[#allocation51_spill] sm:$0xff] %v2811_v48  ;;  %v2822_v15 = vadd.f32 %v764_v29, %v2510_v38  ;;  %v2825_v28 = vadd.f32 %v924_v32, %v2510_v38  ;;  %v766_v63 = vpop.f32.mrb[39].mxu0  ;;  %v926_v14 = vpop.f32.mrb[39].mxu1 }
 0x1d0   : > { %3883 = vst [vmem:[#allocation52_spill] sm:$0xff] %v2817_v21  ;;  %v2830_v1 = vadd.f32 %v766_v63, %v2513_v39  ;;  %v2833_v40 = vadd.f32 %v926_v14, %v2513_v39 }
 0x1d1   : > { %3884 = vst [vmem:[#allocation53_spill] sm:$0xff] %v2825_v28 }
 0x1d2   : > { %3885 = vst [vmem:[#allocation54_spill] sm:$0xff] %v2830_v1  ;;  %3886 = vst [vmem:[#allocation55_spill] sm:$0xff] %v2833_v40 }
 0x1d4   : > { %v770_v48 = vpop.f32.mrb[40].mxu0  ;;  %v930_v31 = vpop.f32.mrb[40].mxu1 }
 0x1d5   : > { %v2840_v57 = vadd.f32 %v770_v48, %v2510_v38  ;;  %v2843_v54 = vadd.f32 %v930_v31, %v2510_v38  ;;  %v772_v63 = vpop.f32.mrb[41].mxu0  ;;  %v932_v21 = vpop.f32.mrb[41].mxu1 }
 0x1d6   : > { %v2846_v14 = vadd.f32 %v772_v63, %v2513_v39  ;;  %v2849_v5 = vadd.f32 %v932_v21, %v2513_v39  ;;  %v774_v29 = vpop.f32.mrb[42].mxu0  ;;  %v934_v61 = vpop.f32.mrb[42].mxu1 }
 0x1d7   : > { %3887 = vst [vmem:[#allocation56_spill] sm:$0xff] %v2840_v57  ;;  %3888 = vst [vmem:[#allocation57_spill] sm:$0xff] %v2843_v54  ;;  %v2854_v48 = vadd.f32 %v774_v29, %v2510_v38  ;;  %v2857_v31 = vadd.f32 %v934_v61, %v2510_v38  ;;  %v776_v28 = vpop.f32.mrb[43].mxu0  ;;  %v936_v27 = vpop.f32.mrb[43].mxu1 }
 0x1d8   : > { %3889 = vst [vmem:[#allocation58_spill] sm:$0xff] %v2846_v14  ;;  %3890 = vst [vmem:[#allocation59_spill] sm:$0xff] %v2849_v5  ;;  %v2862_v21 = vadd.f32 %v776_v28, %v2513_v39  ;;  %v2865_v13 = vadd.f32 %v936_v27, %v2513_v39 }
 0x1d9   : > { %3891 = vst [vmem:[#allocation60_spill] sm:$0xff] %v2854_v48  ;;  %3892 = vst [vmem:[#allocation61_spill] sm:$0xff] %v2857_v31 }
 0x1da   : > { %3893 = vst [vmem:[#allocation62_spill] sm:$0xff] %v2862_v21  ;;  %3894 = vst [vmem:[#allocation63_spill] sm:$0xff] %v2865_v13 }
 0x1dc   : > { %v780_v54 = vpop.f32.mrb[44].mxu0  ;;  %v940_v7 = vpop.f32.mrb[44].mxu1 }
 0x1dd   : > { %v2872_v63 = vadd.f32 %v780_v54, %v2510_v38  ;;  %v2875_v19 = vadd.f32 %v940_v7, %v2510_v38  ;;  %v782_v28 = vpop.f32.mrb[45].mxu0  ;;  %v942_v5 = vpop.f32.mrb[45].mxu1 }
 0x1de   : > { %v2878_v27 = vadd.f32 %v782_v28, %v2513_v39  ;;  %v2881_v40 = vadd.f32 %v942_v5, %v2513_v39  ;;  %v784_v29 = vpop.f32.mrb[46].mxu0  ;;  %v944_v32 = vpop.f32.mrb[46].mxu1 }
 0x1df   : > { %3895 = vst [vmem:[#allocation64_spill] sm:$0xff] %v2872_v63  ;;  %3896 = vst [vmem:[#allocation65_spill] sm:$0xff] %v2875_v19  ;;  %v2886_v54 = vadd.f32 %v784_v29, %v2510_v38  ;;  %v2889_v7 = vadd.f32 %v944_v32, %v2510_v38  ;;  %v786_v31 = vpop.f32.mrb[47].mxu0  ;;  %v946_v3 = vpop.f32.mrb[47].mxu1 }
 0x1e0   : > { %3897 = vst [vmem:[#allocation66_spill] sm:$0xff] %v2878_v27  ;;  %3898 = vst [vmem:[#allocation67_spill] sm:$0xff] %v2881_v40  ;;  %v2894_v5 = vadd.f32 %v786_v31, %v2513_v39  ;;  %v2897_v53 = vadd.f32 %v946_v3, %v2513_v39 }
 0x1e1   : > { %3899 = vst [vmem:[#allocation68_spill] sm:$0xff] %v2886_v54  ;;  %3900 = vst [vmem:[#allocation69_spill] sm:$0xff] %v2889_v7 }
 0x1e2   : > { %3901 = vst [vmem:[#allocation70_spill] sm:$0xff] %v2894_v5  ;;  %3902 = vst [vmem:[#allocation71_spill] sm:$0xff] %v2897_v53 }
 0x1e4   : > { %v790_v19 = vpop.f32.mrb[48].mxu0  ;;  %v950_v47 = vpop.f32.mrb[48].mxu1 }
 0x1e5   : > { %v2904_v28 = vadd.f32 %v790_v19, %v2510_v38  ;;  %v2907_v59 = vadd.f32 %v950_v47, %v2510_v38  ;;  %v792_v31 = vpop.f32.mrb[49].mxu0  ;;  %v952_v40 = vpop.f32.mrb[49].mxu1 }
 0x1e6   : > { %v2910_v3 = vadd.f32 %v792_v31, %v2513_v39  ;;  %v2913_v13 = vadd.f32 %v952_v40, %v2513_v39  ;;  %v794_v29 = vpop.f32.mrb[50].mxu0  ;;  %v954_v61 = vpop.f32.mrb[50].mxu1 }
 0x1e7   : > { %3903 = vst [vmem:[#allocation72_spill] sm:$0xff] %v2904_v28  ;;  %3904 = vst [vmem:[#allocation73_spill] sm:$0xff] %v2907_v59  ;;  %v2918_v19 = vadd.f32 %v794_v29, %v2510_v38  ;;  %v2921_v47 = vadd.f32 %v954_v61, %v2510_v38  ;;  %v796_v7 = vpop.f32.mrb[51].mxu0  ;;  %v956_v43 = vpop.f32.mrb[51].mxu1 }
 0x1e8   : > { %3905 = vst [vmem:[#allocation74_spill] sm:$0xff] %v2910_v3  ;;  %3906 = vst [vmem:[#allocation75_spill] sm:$0xff] %v2913_v13  ;;  %v2926_v40 = vadd.f32 %v796_v7, %v2513_v39  ;;  %v2929_v54 = vadd.f32 %v956_v43, %v2513_v39 }
 0x1e9   : > { %3907 = vst [vmem:[#allocation76_spill] sm:$0xff] %v2918_v19  ;;  %3908 = vst [vmem:[#allocation77_spill] sm:$0xff] %v2921_v47 }
 0x1ea   : > { %3909 = vst [vmem:[#allocation78_spill] sm:$0xff] %v2926_v40  ;;  %3910 = vst [vmem:[#allocation79_spill] sm:$0xff] %v2929_v54 }
 0x1ec   : > { %v800_v59 = vpop.f32.mrb[52].mxu0  ;;  %v960_v28 = vpop.f32.mrb[52].mxu1 }
 0x1ed   : > { %v2936_v31 = vadd.f32 %v800_v59, %v2510_v38  ;;  %v2939_v5 = vadd.f32 %v960_v28, %v2510_v38  ;;  %v802_v7 = vpop.f32.mrb[53].mxu0  ;;  %v962_v13 = vpop.f32.mrb[53].mxu1 }
 0x1ee   : > { %v2942_v43 = vadd.f32 %v802_v7, %v2513_v39  ;;  %v2945_v53 = vadd.f32 %v962_v13, %v2513_v39  ;;  %v804_v29 = vpop.f32.mrb[54].mxu0  ;;  %v964_v32 = vpop.f32.mrb[54].mxu1 }
 0x1ef   : > { %3911 = vst [vmem:[#allocation80_spill] sm:$0xff] %v2936_v31  ;;  %3912 = vst [vmem:[#allocation81_spill] sm:$0xff] %v2939_v5  ;;  %v2950_v59 = vadd.f32 %v804_v29, %v2510_v38  ;;  %v2953_v28 = vadd.f32 %v964_v32, %v2510_v38  ;;  %v806_v47 = vpop.f32.mrb[55].mxu0  ;;  %v966_v40 = vpop.f32.mrb[55].mxu1 }
 0x1f0   : > { %3913 = vst [vmem:[#allocation82_spill] sm:$0xff] %v2942_v43  ;;  %3914 = vst [vmem:[#allocation83_spill] sm:$0xff] %v2945_v53  ;;  %v2958_v13 = vadd.f32 %v806_v47, %v2513_v39  ;;  %v2961_v3 = vadd.f32 %v966_v40, %v2513_v39 }
 0x1f1   : > { %3915 = vst [vmem:[#allocation84_spill] sm:$0xff] %v2950_v59  ;;  %3916 = vst [vmem:[#allocation85_spill] sm:$0xff] %v2953_v28 }
 0x1f2   : > { %3917 = vst [vmem:[#allocation86_spill] sm:$0xff] %v2958_v13  ;;  %3918 = vst [vmem:[#allocation87_spill] sm:$0xff] %v2961_v3 }
 0x1f4   : > { %v810_v5 = vpop.f32.mrb[56].mxu0  ;;  %v970_v31 = vpop.f32.mrb[56].mxu1 }
 0x1f5   : > { %v2968_v7 = vadd.f32 %v810_v5, %v2510_v38  ;;  %v2971_v19 = vadd.f32 %v970_v31, %v2510_v38  ;;  %v812_v47 = vpop.f32.mrb[57].mxu0  ;;  %v972_v53 = vpop.f32.mrb[57].mxu1 }
 0x1f6   : > { %v2974_v40 = vadd.f32 %v812_v47, %v2513_v39  ;;  %v2977_v54 = vadd.f32 %v972_v53, %v2513_v39  ;;  %v814_v29 = vpop.f32.mrb[58].mxu0  ;;  %v974_v61 = vpop.f32.mrb[58].mxu1 }
 0x1f7   : > { %3919 = vst [vmem:[#allocation88_spill] sm:$0xff] %v2968_v7  ;;  %3920 = vst [vmem:[#allocation89_spill] sm:$0xff] %v2971_v19  ;;  %v2982_v5 = vadd.f32 %v814_v29, %v2510_v38  ;;  %v2985_v31 = vadd.f32 %v974_v61, %v2510_v38  ;;  %v816_v28 = vpop.f32.mrb[59].mxu0  ;;  %v976_v13 = vpop.f32.mrb[59].mxu1  ;;  %v3935_v61 = vmax.f32 (!%p1870_p10), %v2558_v6, 0.0 }
 0x1f8   : > { %3921 = vst [vmem:[#allocation90_spill] sm:$0xff] %v2974_v40  ;;  %3922 = vst [vmem:[#allocation91_spill] sm:$0xff] %v2977_v54  ;;  %v2990_v53 = vadd.f32 %v816_v28, %v2513_v39  ;;  %v2993_v43 = vadd.f32 %v976_v13, %v2513_v39 }
 0x1f9   : > { %3923 = vst [vmem:[#allocation92_spill] sm:$0xff] %v2982_v5  ;;  %3924 = vst [vmem:[#allocation93_spill] sm:$0xff] %v2985_v31  ;;  %v3931_v5 = vmax.f32 (!%p1870_p10), %v2534_v52, 0.0  ;;  %v3938_v52 = vmax.f32 (!%p1870_p10), %v2584_v26, 0.0 }
 0x1fa   : > { %3925 = vst [vmem:[#allocation94_spill] sm:$0xff] %v2990_v53  ;;  %3926 = vst [vmem:[#allocation95_spill] sm:$0xff] %v2993_v43  ;;  %v3934_v43 = vmax.f32 (!%p1870_p10), %v2552_v2, 0.0 }
 0x1fc   : > { %v820_v19 = vpop.f32.mrb[60].mxu0  ;;  %v980_v7 = vpop.f32.mrb[60].mxu1  ;;  %1123 = sbr.rel (%p1870_p10) target bundleno = 643 (0x283), region = 48 }
 0x1fd   : > { %v3000_v47 = vadd.f32 %v820_v19, %v2510_v38  ;;  %v3003_v59 = vadd.f32 %v980_v7, %v2510_v38  ;;  %v822_v28 = vpop.f32.mrb[61].mxu0  ;;  %v982_v54 = vpop.f32.mrb[61].mxu1 }
 0x1fe   : > { %v3006_v13 = vadd.f32 %v822_v28, %v2513_v39  ;;  %v3009_v3 = vadd.f32 %v982_v54, %v2513_v39  ;;  %v824_v29 = vpop.f32.mrb[62].mxu0  ;;  %v984_v32 = vpop.f32.mrb[62].mxu1  ;;  %v3932_v28 = vmax.f32 (!%p1870_p10), %v2526_v46, 0.0 }
 0x1ff   : > { %v3014_v19 = vadd.f32 %v824_v29, %v2510_v38  ;;  %v3017_v7 = vadd.f32 %v984_v32, %v2510_v38  ;;  %v826_v31 = vpop.f32.mrb[63].mxu0  ;;  %v986_v53 = vpop.f32.mrb[63].mxu1  ;;  %v3930_v32 = vmax.f32 (!%p1870_p10), %v2520_v42, 0.0  ;;  %v3936_v38 = vmax.f32 (!%p1870_p10), %v2566_v12, 0.0 }
 0x200   : > { %3927 = vst [vmem:[#allocation96_spill] sm:$0xff] %v3009_v3  ;;  %v3022_v54 = vadd.f32 %v826_v31, %v2513_v39  ;;  %v3025_v40 = vadd.f32 %v986_v53, %v2513_v39  ;;  %v3933_v39 = vmax.f32 (!%p1870_p10), %v2542_v58, 0.0  ;;  %v3937_v3 = vmax.f32 (!%p1870_p10), %v2574_v18, 0.0 }
 0x201   : > { %3928 = vst [vmem:[#allocation97_spill] sm:$0xff] %v3017_v7  ;;  %v1126_v31 = vadd.f32 (!%p1870_p10), %v3931_v5, %v3930_v32  ;;  %v3939_v32 = vmax.f32 (!%p1870_p10), %v2590_v30, 0.0 }
 0x202   : > { %3929 = vst [vmem:[#allocation98_spill] sm:$0xff] %v3025_v40  ;;  %v1189_v53 = vadd.f32 (!%p1870_p10), %v3933_v39, %v3932_v28  ;;  %v3940_v28 = vmax.f32 (!%p1870_p10), %v2598_v37, 0.0 }
 0x203   : > { %v1127_v29 = vadd.f32 %v1126_v31, %v3934_v43  ;;  %v3941_v43 = vmax.f32 %v2606_v49, 0.0 }
 0x204   : > { %v1190_v7 = vadd.f32 %v1189_v53, %v3935_v61  ;;  %v3942_v61 = vmax.f32 %v2616_v9, 0.0 }
 0x205   : > { %v1128_v40 = vadd.f32 %v1127_v29, %v3936_v38  ;;  %v3943_v29 = vmax.f32 %v2622_v25, 0.0 }
 0x206   : > { %v1191_v42 = vadd.f32 %v1190_v7, %v3937_v3  ;;  %v3944_v3 = vmax.f32 %v2630_v44, 0.0 }
 0x207   : > { %v1129_v5 = vadd.f32 %v1128_v40, %v3938_v52  ;;  %v3945_v52 = vmax.f32 %v2638_v24, 0.0 }
 0x208   : > { %v1192_v46 = vadd.f32 %v1191_v42, %v3939_v32  ;;  %v3946_v42 = vmax.f32 %v2648_v17, 0.0 }
 0x209   : > { %v1130_v39 = vadd.f32 %v1129_v5, %v3940_v28  ;;  %v3947_v5 = vmax.f32 %v2654_v4, 0.0 }
 0x20a   : > { %v1193_v31 = vadd.f32 %v1192_v46, %v3941_v43  ;;  %v3948_v46 = vmax.f32 %v2662_v23, 0.0 }
 0x20b   : > { %v1131_v53 = vadd.f32 %v1130_v39, %v3942_v61  ;;  %v3949_v39 = vmax.f32 %v2670_v11, 0.0 }
 0x20c   : > { %v1194_v38 = vadd.f32 %v1193_v31, %v3943_v29  ;;  %v3950_v31 = vmax.f32 %v2680_v8, 0.0 }
 0x20d   : > { %v1132_v7 = vadd.f32 %v1131_v53, %v3944_v3  ;;  %v3951_v53 = vmax.f32 %v2686_v36, 0.0 }
 0x20e   : > { %v1195_v40 = vadd.f32 %v1194_v38, %v3945_v52  ;;  %v3952_v38 = vmax.f32 %v2694_v33, 0.0 }
 0x20f   : > { %v1133_v32 = vadd.f32 %v1132_v7, %v3946_v42  ;;  %v3953_v7 = vmax.f32 %v2702_v55, 0.0 }
 0x210   : > { %v1196_v28 = vadd.f32 %v1195_v40, %v3947_v5  ;;  %v3954_v40 = vmax.f32 %v2712_v51, 0.0 }
 0x211   : > { %v1134_v43 = vadd.f32 %v1133_v32, %v3948_v46  ;;  %v3955_v32 = vmax.f32 %v2718_v22, 0.0 }
 0x212   : > { %v1197_v61 = vadd.f32 %v1196_v28, %v3949_v39  ;;  %v3956_v28 = vmax.f32 %v2726_v10, 0.0 }
 0x213   : > { %v1135_v29 = vadd.f32 %v1134_v43, %v3950_v31  ;;  %v3957_v43 = vmax.f32 %v2734_v56, 0.0 }
 0x214   : > { %v1198_v3 = vadd.f32 %v1197_v61, %v3951_v53  ;;  %v3958_v61 = vmax.f32 %v2744_v35, 0.0 }
 0x215   : > { %v1136_v52 = vadd.f32 %v1135_v29, %v3952_v38  ;;  %v3959_v29 = vmax.f32 %v2750_v34, 0.0 }
 0x216   : > { %v1199_v42 = vadd.f32 %v1198_v3, %v3953_v7  ;;  %v3960_v3 = vmax.f32 %v2758_v20, 0.0 }
 0x217   : > { %v1137_v5 = vadd.f32 %v1136_v52, %v3954_v40  ;;  %v3961_v52 = vmax.f32 %v2766_v45, 0.0 }
 0x218   : > { %v1200_v46 = vadd.f32 %v1199_v42, %v3955_v32  ;;  %v3962_v42 = vmax.f32 %v2776_v50, 0.0 }
 0x219   : > { %v1138_v39 = vadd.f32 %v1137_v5, %v3956_v28  ;;  %v3963_v5 = vmax.f32 %v2782_v41, 0.0 }
 0x21a   : > { %v1201_v31 = vadd.f32 %v1200_v46, %v3957_v43  ;;  %v3964_v46 = vmax.f32 %v2790_v16, 0.0 }
 0x21b   : > { %v1139_v53 = vadd.f32 %v1138_v39, %v3958_v61  ;;  %v3965_v39 = vmax.f32 %v2798_v60, 0.0 }
 0x21c   : > { %v1202_v38 = vadd.f32 %v1201_v31, %v3959_v29  ;;  %v3966_v31 = vmax.f32 %v2808_v62, 0.0 }
 0x21d   : > { %v1140_v7 = vadd.f32 %v1139_v53, %v3960_v3  ;;  %v3967_v53 = vmax.f32 %v2814_v0, 0.0 }
 0x21e   : > { %v1203_v40 = vadd.f32 %v1202_v38, %v3961_v52  ;;  %v3968_v38 = vmax.f32 %v2822_v15, 0.0 }
 0x21f   : > { %v1141_v32 = vadd.f32 %v1140_v7, %v3962_v42  ;;  %v3969_v7 = vmax.f32 %v2830_v1, 0.0  ;;  %v3976_v1 = vld [vmem:[#allocation68_spill] sm:$0xff] }
 0x220   : > { %v1204_v28 = vadd.f32 %v1203_v40, %v3963_v5  ;;  %v3970_v40 = vmax.f32 %v2840_v57, 0.0  ;;  %v3978_v57 = vld [vmem:[#allocation70_spill] sm:$0xff] }
 0x221   : > { %v1142_v43 = vadd.f32 %v1141_v32, %v3964_v46  ;;  %v3971_v32 = vmax.f32 %v2846_v14, 0.0  ;;  %v3980_v14 = vld [vmem:[#allocation72_spill] sm:$0xff] }
 0x222   : > { %v1205_v61 = vadd.f32 %v1204_v28, %v3965_v39  ;;  %v3972_v28 = vmax.f32 %v2854_v48, 0.0  ;;  %v3982_v48 = vld [vmem:[#allocation74_spill] sm:$0xff] }
 0x223   : > { %v1143_v29 = vadd.f32 %v1142_v43, %v3966_v31  ;;  %v3973_v43 = vmax.f32 %v2862_v21, 0.0  ;;  %v3984_v21 = vld [vmem:[#allocation76_spill] sm:$0xff] }
 0x224   : > { %v1206_v3 = vadd.f32 %v1205_v61, %v3967_v53  ;;  %v3974_v61 = vmax.f32 %v2872_v63, 0.0  ;;  %v3986_v63 = vld [vmem:[#allocation78_spill] sm:$0xff] }
 0x225   : > { %v1144_v52 = vadd.f32 %v1143_v29, %v3968_v38  ;;  %v3975_v29 = vmax.f32 %v2878_v27, 0.0  ;;  %v3988_v27 = vld [vmem:[#allocation80_spill] sm:$0xff] }
 0x226   : > { %v1207_v42 = vadd.f32 %v1206_v3, %v3969_v7  ;;  %v3977_v3 = vmax.f32 %v3976_v1, 0.0  ;;  %v3990_v1 = vld [vmem:[#allocation82_spill] sm:$0xff] }
 0x227   : > { %v1145_v5 = vadd.f32 %v1144_v52, %v3970_v40  ;;  %v3979_v52 = vmax.f32 %v3978_v57, 0.0  ;;  %v3992_v57 = vld [vmem:[#allocation84_spill] sm:$0xff] }
 0x228   : > { %v1208_v46 = vadd.f32 %v1207_v42, %v3971_v32  ;;  %v3981_v42 = vmax.f32 %v3980_v14, 0.0  ;;  %v3994_v14 = vld [vmem:[#allocation86_spill] sm:$0xff] }
 0x229   : > { %v1146_v39 = vadd.f32 %v1145_v5, %v3972_v28  ;;  %v3983_v5 = vmax.f32 %v3982_v48, 0.0  ;;  %v3996_v48 = vld [vmem:[#allocation88_spill] sm:$0xff] }
 0x22a   : > { %v1209_v31 = vadd.f32 %v1208_v46, %v3973_v43  ;;  %v3985_v46 = vmax.f32 %v3984_v21, 0.0  ;;  %v3998_v21 = vld [vmem:[#allocation90_spill] sm:$0xff] }
 0x22b   : > { %v1147_v53 = vadd.f32 %v1146_v39, %v3974_v61  ;;  %v3987_v39 = vmax.f32 %v3986_v63, 0.0  ;;  %v4000_v63 = vld [vmem:[#allocation92_spill] sm:$0xff] }
 0x22c   : > { %v1210_v38 = vadd.f32 %v1209_v31, %v3975_v29  ;;  %v3989_v31 = vmax.f32 %v3988_v27, 0.0  ;;  %v4002_v27 = vld [vmem:[#allocation94_spill] sm:$0xff] }
 0x22d   : > { %v1148_v7 = vadd.f32 %v1147_v53, %v3977_v3  ;;  %v3991_v53 = vmax.f32 %v3990_v1, 0.0 }
 0x22e   : > { %v1211_v40 = vadd.f32 %v1210_v38, %v3979_v52  ;;  %v3993_v38 = vmax.f32 %v3992_v57, 0.0 }
 0x22f   : > { %v1149_v32 = vadd.f32 %v1148_v7, %v3981_v42  ;;  %v3995_v7 = vmax.f32 %v3994_v14, 0.0  ;;  %v4008_v14 = vld [vmem:[#allocation13_spill] sm:$0xff] }
 0x230   : > { %v1212_v28 = vadd.f32 %v1211_v40, %v3983_v5  ;;  %v3997_v40 = vmax.f32 %v3996_v48, 0.0  ;;  %v4010_v48 = vld [vmem:[#allocation15_spill] sm:$0xff] }
 0x231   : > { %v1150_v43 = vadd.f32 %v1149_v32, %v3985_v46  ;;  %v3999_v32 = vmax.f32 %v3998_v21, 0.0  ;;  %v4012_v21 = vld [vmem:[#allocation17_spill] sm:$0xff] }
 0x232   : > { %v1213_v61 = vadd.f32 %v1212_v28, %v3987_v39  ;;  %v4001_v28 = vmax.f32 %v4000_v63, 0.0  ;;  %v4014_v63 = vld [vmem:[#allocation18_spill] sm:$0xff] }
 0x233   : > { %v1151_v29 = vadd.f32 %v1150_v43, %v3989_v31  ;;  %v4003_v43 = vmax.f32 %v4002_v27, 0.0  ;;  %v4016_v27 = vld [vmem:[#allocation19_spill] sm:$0xff] }
 0x234   : > { %v1214_v3 = vadd.f32 %v1213_v61, %v3991_v53  ;;  %v4004_v61 = vmax.f32 %v3000_v47, 0.0 }
 0x235   : > { %v1152_v52 = vadd.f32 %v1151_v29, %v3993_v38  ;;  %v4005_v29 = vmax.f32 %v3006_v13, 0.0  ;;  %v4007_v38 = vmax.f32 %v3022_v54, 0.0 }
 0x236   : > { %v1215_v42 = vadd.f32 %v1214_v3, %v3995_v7  ;;  %v4006_v3 = vmax.f32 %v3014_v19, 0.0  ;;  %v4009_v7 = vmax.f32 %v4008_v14, 0.0  ;;  %v4022_v14 = vld [vmem:[#allocation22_spill] sm:$0xff] }
 0x237   : > { %v1153_v5 = vadd.f32 %v1152_v52, %v3997_v40  ;;  %v4011_v40 = vmax.f32 %v4010_v48, 0.0  ;;  %v4024_v48 = vld [vmem:[#allocation23_spill] sm:$0xff] }
 0x238   : > { %v1216_v46 = vadd.f32 %v1215_v42, %v3999_v32  ;;  %v4013_v32 = vmax.f32 %v4012_v21, 0.0  ;;  %v4026_v21 = vld [vmem:[#allocation24_spill] sm:$0xff] }
 0x239   : > { %v1154_v39 = vadd.f32 %v1153_v5, %v4001_v28  ;;  %v4015_v28 = vmax.f32 %v4014_v63, 0.0  ;;  %v4028_v63 = vld [vmem:[#allocation25_spill] sm:$0xff] }
 0x23a   : > { %v1217_v31 = vadd.f32 %v1216_v46, %v4003_v43  ;;  %v4017_v43 = vmax.f32 %v4016_v27, 0.0  ;;  %v4030_v27 = vld [vmem:[#allocation26_spill] sm:$0xff] }
 0x23b   : > { %v1155_v1 = vadd.f32 %v1154_v39, %v4004_v61  ;;  %v4018_v61 = vld [vmem:[#allocation20_spill] sm:$0xff] }
 0x23c   : > { %v1218_v53 = vadd.f32 %v1217_v31, %v4005_v29 }
 0x23d   : > { %v1156_v57 = vadd.f32 %v1155_v1, %v4006_v3  ;;  %v4019_v1 = vmax.f32 %v4018_v61, 0.0  ;;  %v4020_v3 = vld [vmem:[#allocation21_spill] sm:$0xff]  ;;  %v4032_v61 = vld [vmem:[#allocation27_spill] sm:$0xff] }
 0x23e   : > { %v1219_v52 = vadd.f32 %v1218_v53, %v4007_v38  ;;  %v4021_v53 = vmax.f32 %v4020_v3, 0.0  ;;  %v4034_v3 = vld [vmem:[#allocation28_spill] sm:$0xff] }
 0x23f   : > { %v1157_v42 = vadd.f32 %v1156_v57, %v4009_v7  ;;  %v4023_v57 = vmax.f32 %v4022_v14, 0.0  ;;  %v4036_v14 = vld [vmem:[#allocation29_spill] sm:$0xff] }
 0x240   : > { %v1220_v5 = vadd.f32 %v1219_v52, %v4011_v40  ;;  %v4025_v52 = vmax.f32 %v4024_v48, 0.0  ;;  %v4038_v48 = vld [vmem:[#allocation30_spill] sm:$0xff] }
 0x241   : > { %v1158_v46 = vadd.f32 %v1157_v42, %v4013_v32  ;;  %v4027_v42 = vmax.f32 %v4026_v21, 0.0  ;;  %v4040_v21 = vld [vmem:[#allocation31_spill] sm:$0xff] }
 0x242   : > { %v1221_v39 = vadd.f32 %v1220_v5, %v4015_v28  ;;  %v4029_v5 = vmax.f32 %v4028_v63, 0.0  ;;  %v4042_v63 = vld [vmem:[#allocation32_spill] sm:$0xff] }
 0x243   : > { %v1159_v31 = vadd.f32 %v1158_v46, %v4017_v43  ;;  %v4031_v46 = vmax.f32 %v4030_v27, 0.0  ;;  %v4044_v27 = vld [vmem:[#allocation33_spill] sm:$0xff] }
 0x244   : > { %v1222_v29 = vadd.f32 %v1221_v39, %v4019_v1  ;;  %v4033_v39 = vmax.f32 %v4032_v61, 0.0  ;;  %v4046_v61 = vld [vmem:[#allocation34_spill] sm:$0xff] }
 0x245   : > { %v1160_v38 = vadd.f32 %v1159_v31, %v4021_v53  ;;  %v4035_v31 = vmax.f32 %v4034_v3, 0.0  ;;  %v4048_v3 = vld [vmem:[#allocation35_spill] sm:$0xff] }
 0x246   : > { %v1223_v7 = vadd.f32 %v1222_v29, %v4023_v57  ;;  %v4037_v29 = vmax.f32 %v4036_v14, 0.0  ;;  %v4050_v14 = vld [vmem:[#allocation36_spill] sm:$0xff] }
 0x247   : > { %v1161_v40 = vadd.f32 %v1160_v38, %v4025_v52  ;;  %v4039_v38 = vmax.f32 %v4038_v48, 0.0  ;;  %v4052_v48 = vld [vmem:[#allocation37_spill] sm:$0xff] }
 0x248   : > { %v1224_v32 = vadd.f32 %v1223_v7, %v4027_v42  ;;  %v4041_v7 = vmax.f32 %v4040_v21, 0.0  ;;  %v4054_v21 = vld [vmem:[#allocation38_spill] sm:$0xff] }
 0x249   : > { %v1162_v28 = vadd.f32 %v1161_v40, %v4029_v5  ;;  %v4043_v40 = vmax.f32 %v4042_v63, 0.0  ;;  %v4056_v63 = vld [vmem:[#allocation39_spill] sm:$0xff] }
 0x24a   : > { %v1225_v43 = vadd.f32 %v1224_v32, %v4031_v46  ;;  %v4045_v32 = vmax.f32 %v4044_v27, 0.0  ;;  %v4058_v27 = vld [vmem:[#allocation40_spill] sm:$0xff] }
 0x24b   : > { %v1163_v1 = vadd.f32 %v1162_v28, %v4033_v39  ;;  %v4047_v28 = vmax.f32 %v4046_v61, 0.0  ;;  %v4060_v61 = vld [vmem:[#allocation41_spill] sm:$0xff] }
 0x24c   : > { %v1226_v53 = vadd.f32 %v1225_v43, %v4035_v31  ;;  %v4049_v43 = vmax.f32 %v4048_v3, 0.0  ;;  %v4062_v3 = vld [vmem:[#allocation42_spill] sm:$0xff] }
 0x24d   : > { %v1164_v57 = vadd.f32 %v1163_v1, %v4037_v29  ;;  %v4051_v1 = vmax.f32 %v4050_v14, 0.0  ;;  %v4064_v14 = vld [vmem:[#allocation43_spill] sm:$0xff] }
 0x24e   : > { %v1227_v52 = vadd.f32 %v1226_v53, %v4039_v38  ;;  %v4053_v53 = vmax.f32 %v4052_v48, 0.0  ;;  %v4066_v48 = vld [vmem:[#allocation44_spill] sm:$0xff] }
 0x24f   : > { %v1165_v42 = vadd.f32 %v1164_v57, %v4041_v7  ;;  %v4055_v57 = vmax.f32 %v4054_v21, 0.0  ;;  %v4068_v21 = vld [vmem:[#allocation45_spill] sm:$0xff] }
 0x250   : > { %v1228_v5 = vadd.f32 %v1227_v52, %v4043_v40  ;;  %v4057_v52 = vmax.f32 %v4056_v63, 0.0  ;;  %v4070_v63 = vld [vmem:[#allocation46_spill] sm:$0xff] }
 0x251   : > { %v1166_v46 = vadd.f32 %v1165_v42, %v4045_v32  ;;  %v4059_v42 = vmax.f32 %v4058_v27, 0.0  ;;  %v4072_v27 = vld [vmem:[#allocation47_spill] sm:$0xff] }
 0x252   : > { %v1229_v39 = vadd.f32 %v1228_v5, %v4047_v28  ;;  %v4061_v5 = vmax.f32 %v4060_v61, 0.0  ;;  %v4074_v61 = vld [vmem:[#allocation48_spill] sm:$0xff] }
 0x253   : > { %v1167_v31 = vadd.f32 %v1166_v46, %v4049_v43  ;;  %v4063_v46 = vmax.f32 %v4062_v3, 0.0  ;;  %v4076_v3 = vld [vmem:[#allocation49_spill] sm:$0xff] }
 0x254   : > { %v1230_v29 = vadd.f32 %v1229_v39, %v4051_v1  ;;  %v4065_v39 = vmax.f32 %v4064_v14, 0.0  ;;  %v4078_v14 = vld [vmem:[#allocation50_spill] sm:$0xff] }
 0x255   : > { %v1168_v38 = vadd.f32 %v1167_v31, %v4053_v53  ;;  %v4067_v31 = vmax.f32 %v4066_v48, 0.0  ;;  %v4080_v48 = vld [vmem:[#allocation51_spill] sm:$0xff] }
 0x256   : > { %v1231_v7 = vadd.f32 %v1230_v29, %v4055_v57  ;;  %v4069_v29 = vmax.f32 %v4068_v21, 0.0  ;;  %v4082_v21 = vld [vmem:[#allocation52_spill] sm:$0xff] }
 0x257   : > { %v1169_v40 = vadd.f32 %v1168_v38, %v4057_v52  ;;  %v4071_v38 = vmax.f32 %v4070_v63, 0.0  ;;  %v4084_v63 = vld [vmem:[#allocation53_spill] sm:$0xff] }
 0x258   : > { %v1232_v32 = vadd.f32 %v1231_v7, %v4059_v42  ;;  %v4073_v7 = vmax.f32 %v4072_v27, 0.0  ;;  %v4086_v27 = vld [vmem:[#allocation55_spill] sm:$0xff] }
 0x259   : > { %v1170_v28 = vadd.f32 %v1169_v40, %v4061_v5  ;;  %v4075_v40 = vmax.f32 %v4074_v61, 0.0  ;;  %v4088_v61 = vld [vmem:[#allocation57_spill] sm:$0xff] }
 0x25a   : > { %v1233_v43 = vadd.f32 %v1232_v32, %v4063_v46  ;;  %v4077_v32 = vmax.f32 %v4076_v3, 0.0  ;;  %v4090_v3 = vld [vmem:[#allocation59_spill] sm:$0xff] }
 0x25b   : > { %v1171_v1 = vadd.f32 %v1170_v28, %v4065_v39  ;;  %v4079_v28 = vmax.f32 %v4078_v14, 0.0  ;;  %v4092_v14 = vld [vmem:[#allocation61_spill] sm:$0xff] }
 0x25c   : > { %v1234_v53 = vadd.f32 %v1233_v43, %v4067_v31  ;;  %v4081_v43 = vmax.f32 %v4080_v48, 0.0  ;;  %v4094_v48 = vld [vmem:[#allocation63_spill] sm:$0xff] }
 0x25d   : > { %v1172_v57 = vadd.f32 %v1171_v1, %v4069_v29  ;;  %v4083_v1 = vmax.f32 %v4082_v21, 0.0  ;;  %v4096_v21 = vld [vmem:[#allocation65_spill] sm:$0xff] }
 0x25e   : > { %v1235_v52 = vadd.f32 %v1234_v53, %v4071_v38  ;;  %v4085_v53 = vmax.f32 %v4084_v63, 0.0  ;;  %v4098_v63 = vld [vmem:[#allocation67_spill] sm:$0xff] }
 0x25f   : > { %v1173_v42 = vadd.f32 %v1172_v57, %v4073_v7  ;;  %v4087_v57 = vmax.f32 %v4086_v27, 0.0  ;;  %v4100_v27 = vld [vmem:[#allocation69_spill] sm:$0xff] }
 0x260   : > { %v1236_v5 = vadd.f32 %v1235_v52, %v4075_v40  ;;  %v4089_v52 = vmax.f32 %v4088_v61, 0.0  ;;  %v4102_v61 = vld [vmem:[#allocation71_spill] sm:$0xff] }
 0x261   : > { %v1174_v46 = vadd.f32 %v1173_v42, %v4077_v32  ;;  %v4091_v42 = vmax.f32 %v4090_v3, 0.0 }
 0x262   : > { %v1237_v39 = vadd.f32 %v1236_v5, %v4079_v28  ;;  %v4093_v5 = vmax.f32 %v4092_v14, 0.0 }
 0x263   : > { %v1175_v31 = vadd.f32 %v1174_v46, %v4081_v43  ;;  %v4095_v46 = vmax.f32 %v4094_v48, 0.0 }
 0x264   : > { %v1238_v29 = vadd.f32 %v1237_v39, %v4083_v1  ;;  %v4097_v39 = vmax.f32 %v4096_v21, 0.0 }
 0x265   : > { %v1176_v38 = vadd.f32 %v1175_v31, %v4085_v53  ;;  %v4099_v31 = vmax.f32 %v4098_v63, 0.0 }
 0x266   : > { %v1239_v7 = vadd.f32 %v1238_v29, %v4087_v57  ;;  %v4101_v29 = vmax.f32 %v4100_v27, 0.0 }
 0x267   : > { %v1177_v40 = vadd.f32 %v1176_v38, %v4089_v52  ;;  %v4103_v38 = vmax.f32 %v4102_v61, 0.0 }
 0x268   : > { %v1240_v32 = vadd.f32 %v1239_v7, %v4091_v42  ;;  %v4104_v7 = vld [vmem:[#allocation73_spill] sm:$0xff]  ;;  %v4106_v42 = vld [vmem:[#allocation75_spill] sm:$0xff] }
 0x269   : > { %v1178_v28 = vadd.f32 %v1177_v40, %v4093_v5  ;;  %v4105_v3 = vmax.f32 %v4104_v7, 0.0  ;;  %v4107_v14 = vmax.f32 %v4106_v42, 0.0  ;;  %v4108_v5 = vld [vmem:[#allocation77_spill] sm:$0xff] }
 0x26a   : > { %v1241_v43 = vadd.f32 %v1240_v32, %v4095_v46  ;;  %v4109_v48 = vmax.f32 %v4108_v5, 0.0  ;;  %v4110_v46 = vld [vmem:[#allocation79_spill] sm:$0xff] }
 0x26b   : > { %v1179_v1 = vadd.f32 %v1178_v28, %v4097_v39  ;;  %v4111_v21 = vmax.f32 %v4110_v46, 0.0  ;;  %v4112_v39 = vld [vmem:[#allocation81_spill] sm:$0xff] }
 0x26c   : > { %v1242_v53 = vadd.f32 %v1241_v43, %v4099_v31  ;;  %v4113_v63 = vmax.f32 %v4112_v39, 0.0  ;;  %v4114_v31 = vld [vmem:[#allocation83_spill] sm:$0xff] }
 0x26d   : > { %v1180_v57 = vadd.f32 %v1179_v1, %v4101_v29  ;;  %v4115_v27 = vmax.f32 %v4114_v31, 0.0  ;;  %v4116_v29 = vld [vmem:[#allocation85_spill] sm:$0xff] }
 0x26e   : > { %v1243_v52 = vadd.f32 %v1242_v53, %v4103_v38  ;;  %v4117_v61 = vmax.f32 %v4116_v29, 0.0  ;;  %v4118_v38 = vld [vmem:[#allocation87_spill] sm:$0xff] }
 0x26f   : > { %v1181_v40 = vadd.f32 %v1180_v57, %v4105_v3  ;;  %v4119_v7 = vmax.f32 %v4118_v38, 0.0  ;;  %v4120_v3 = vld [vmem:[#allocation89_spill] sm:$0xff] }
 0x270   : > { %v1244_v32 = vadd.f32 %v1243_v52, %v4107_v14  ;;  %v4121_v42 = vmax.f32 %v4120_v3, 0.0  ;;  %v4122_v14 = vld [vmem:[#allocation91_spill] sm:$0xff]  ;;  %v4131_v38 = vld [vmem:[#allocation97_spill] sm:$0xff]  ;;  %v4133_v3 = vld [vmem:[#allocation98_spill] sm:$0xff] }
 0x271   : > { %v1182_v28 = vadd.f32 %v1181_v40, %v4109_v48  ;;  %v4123_v5 = vmax.f32 %v4122_v14, 0.0  ;;  %v4124_v48 = vld [vmem:[#allocation93_spill] sm:$0xff] }
 0x272   : > { %v1245_v43 = vadd.f32 %v1244_v32, %v4111_v21  ;;  %v4125_v46 = vmax.f32 %v4124_v48, 0.0  ;;  %v4126_v21 = vld [vmem:[#allocation95_spill] sm:$0xff] }
 0x273   : > { %v1183_v1 = vadd.f32 %v1182_v28, %v4113_v63  ;;  %v4127_v39 = vmax.f32 %v4126_v21, 0.0 }
 0x274   : > { %v1246_v53 = vadd.f32 %v1245_v43, %v4115_v27  ;;  %v4128_v43 = vmax.f32 %v3003_v59, 0.0  ;;  %v4129_v27 = vld [vmem:[#allocation96_spill] sm:$0xff] }
 0x275   : > { %v1184_v57 = vadd.f32 %v1183_v1, %v4117_v61  ;;  %v4130_v1 = vmax.f32 %v4129_v27, 0.0  ;;  %v1124_v61 = vld [vmem:[%s2371_s5] sm:$0xff] }
 0x276   : > { %v1247_v52 = vadd.f32 %v1246_v53, %v4119_v7  ;;  %v1125_v53 = vld [vmem:[%s2371_s5 + $0x8] sm:$0xff]  ;;  %v4132_v7 = vmax.f32 %v4131_v38, 0.0 }
 0x277   : > { %v1185_v40 = vadd.f32 %v1184_v57, %v4121_v42  ;;  %v4134_v42 = vmax.f32 %v4133_v3, 0.0 }
 0x278   : > { %v1248_v32 = vadd.f32 %v1247_v52, %v4123_v5 }
 0x279   : > { %v1186_v28 = vadd.f32 %v1185_v40, %v4125_v46 }
 0x27a   : > { %v1249_v63 = vadd.f32 %v1248_v32, %v4127_v39 }
 0x27b   : > { %v1187_v31 = vadd.f32 %v1186_v28, %v4128_v43 }
 0x27c   : > { %v1250_v29 = vadd.f32 %v1249_v63, %v4130_v1 }
 0x27d   : > { %v1188_v57 = vadd.f32 %v1187_v31, %v4132_v7 }
 0x27e   : > { %v1251_v52 = vadd.f32 %v1250_v29, %v4134_v42 }
 0x27f   : > { %v1252_v14 = vadd.f32 %v1188_v57, %v1124_v61 }
 0x280   : > { %v1253_v5 = vadd.f32 %v1251_v52, %v1125_v53 }
 0x281   : > { %1254 = vst [vmem:[%s2371_s5] sm:$0xff] %v1252_v14 }
 0x282   : > { %1255 = vst [vmem:[%s2371_s5 + $0x8] sm:$0xff] %v1253_v5 }
 0x283 PF: > { %p1871_p12 = scmp.le.s32.totalorder %s2517_s24, 1000 }
 0x284   : > { %v4135_v40 = vld [vmem:[#allocation11_spill] sm:$0xff] (!%p1871_p12)  ;;  %v3296_v48 = vstv (!%p1871_p12), %s1881_s11  ;;  %v4136_v61 = vld [vmem:[#allocation12_spill] sm:$0xff] (!%p1871_p12)  ;;  %v4138_v7 = vld [vmem:[#allocation14_spill] sm:$0xff] (!%p1871_p12)  ;;  %v4142_v5 = vmax.f32 (!%p1871_p12), %v2542_v58, 0.0 }
 0x285   : > { %1259 = sbr.rel (%p1871_p12) target bundleno = 795 (0x31b), region = 52  ;;  %v1263_v32 = vadd.s32 (!%p1871_p12), 8, %v4135_v40  ;;  %v1264_v46 = vadd.s32 (!%p1871_p12), 16, %v4135_v40  ;;  %v1265_v28 = vadd.s32 (!%p1871_p12), 24, %v4135_v40  ;;  %v1327_v21 = vadd.s32 (!%p1871_p12), %v3296_v48, %v4135_v40  ;;  %v4140_v42 = vld [vmem:[#allocation16_spill] sm:$0xff] (!%p1871_p12) }
 0x286   : > { %v1266_v63 = vadd.s32 (!%p1871_p12), 32, %v4135_v40  ;;  %v1267_v31 = vadd.s32 (!%p1871_p12), 40, %v4135_v40  ;;  %v1268_v1 = vadd.s32 (!%p1871_p12), 48, %v4135_v40  ;;  %v4137_v53 = vmax.f32 (!%p1871_p12), %v4136_v61, 0.0 }
 0x287   : > { %v1328_v39 = vadd.s32 (!%p1871_p12), %v3296_v48, %v1263_v32  ;;  %v1329_v43 = vadd.s32 (!%p1871_p12), %v3296_v48, %v1264_v46  ;;  %v1330_v27 = vadd.s32 (!%p1871_p12), %v3296_v48, %v1265_v28  ;;  %vm1391_vm0 = vcmp.lt.s32.totalorder (!%p1871_p12), %v1327_v21, 1000 }
 0x288   : > { %v1331_v29 = vadd.s32 (!%p1871_p12), %v3296_v48, %v1266_v63  ;;  %v1455_v38 = vsel (!%p1871_p12), %vm1391_vm0, %v4137_v53, 0.0  ;;  %v4139_v57 = vmax.f32 (!%p1871_p12), %v4138_v7, 0.0  ;;  %v4141_v52 = vmax.f32 (!%p1871_p12), %v4140_v42, 0.0 }
 0x289   : > { %vm1392_vm1 = vcmp.lt.s32.totalorder (!%p1871_p12), %v1328_v39, 1000  ;;  %vm1393_vm2 = vcmp.lt.s32.totalorder (!%p1871_p12), %v1329_v43, 1000  ;;  %v1269_v46 = vadd.s32 (!%p1871_p12), 56, %v4135_v40  ;;  %v1332_v28 = vadd.s32 (!%p1871_p12), %v3296_v48, %v1267_v31 }
 0x28a   : > { %v1456_v3 = vsel (!%p1871_p12), %vm1391_vm0, %v4139_v57, 0.0  ;;  %v1457_v14 = vsel (!%p1871_p12), %vm1392_vm1, %v4141_v52, 0.0  ;;  %v1458_v32 = vsel (!%p1871_p12), %vm1392_vm1, %v4142_v5, 0.0  ;;  %vm1394_vm3 = vcmp.lt.s32.totalorder (!%p1871_p12), %v1330_v27, 1000 }
 0x28b   : > { %v1270_v21 = vadd.s32 (!%p1871_p12), 64, %v4135_v40  ;;  %v4143_v39 = vmax.f32 (!%p1871_p12), %v2552_v2, 0.0  ;;  %v4144_v43 = vmax.f32 (!%p1871_p12), %v2558_v6, 0.0  ;;  %v1333_v53 = vadd.s32 (!%p1871_p12), %v3296_v48, %v1268_v1 }
 0x28c   : > { %vm1395_vm4 = vcmp.lt.s32.totalorder %v1331_v29, 1000  ;;  %v1585_v7 = vadd.f32 %v1457_v14, %v1455_v38  ;;  %v1648_v57 = vadd.f32 %v1458_v32, %v1456_v3  ;;  %v1271_v58 = vadd.s32 72, %v4135_v40 }
 0x28d   : > { %v1459_v63 = vsel %vm1393_vm2, %v4143_v39, 0.0  ;;  %v1460_v61 = vsel %vm1393_vm2, %v4144_v43, 0.0  ;;  %v4145_v42 = vmax.f32 %v2566_v12, 0.0  ;;  %v4146_v31 = vmax.f32 %v2574_v18, 0.0 }
 0x28e   : > { %v1334_v5 = vadd.s32 %v3296_v48, %v1269_v46  ;;  %vm1396_vm5 = vcmp.lt.s32.totalorder %v1332_v28, 1000  ;;  %v1586_v2 = vadd.f32 %v1585_v7, %v1459_v63  ;;  %v1649_v39 = vadd.f32 %v1648_v57, %v1460_v61 }
 0x28f   : > { %v1461_v52 = vsel %vm1394_vm3, %v4145_v42, 0.0  ;;  %v1462_v27 = vsel %vm1394_vm3, %v4146_v31, 0.0  ;;  %v1272_v6 = vadd.s32 80, %v4135_v40  ;;  %v4147_v1 = vmax.f32 %v2584_v26, 0.0 }
 0x290   : > { %v4148_v38 = vmax.f32 %v2590_v30, 0.0  ;;  %v1335_v14 = vadd.s32 %v3296_v48, %v1270_v21  ;;  %vm1397_vm6 = vcmp.lt.s32.totalorder %v1333_v53, 1000  ;;  %v1587_v12 = vadd.f32 %v1586_v2, %v1461_v52 }
 0x291   : > { %v1463_v29 = vsel %vm1395_vm4, %v4147_v1, 0.0  ;;  %v1650_v32 = vadd.f32 %v1649_v39, %v1462_v27  ;;  %v1273_v18 = vadd.s32 88, %v4135_v40  ;;  %v4149_v46 = vmax.f32 %v2598_v37, 0.0 }
 0x292   : > { %v1464_v3 = vsel %vm1395_vm4, %v4148_v38, 0.0  ;;  %v4150_v63 = vmax.f32 %v2606_v49, 0.0  ;;  %v1336_v61 = vadd.s32 %v3296_v48, %v1271_v58  ;;  %vm1398_vm7 = vcmp.lt.s32.totalorder %v1334_v5, 1000 }
 0x293   : > { %v1465_v28 = vsel %vm1396_vm5, %v4149_v46, 0.0  ;;  %v1588_v26 = vadd.f32 %v1587_v12, %v1463_v29  ;;  %v1651_v7 = vadd.f32 %v1650_v32, %v1464_v3  ;;  %v1274_v30 = vadd.s32 96, %v4135_v40 }
 0x294   : > { %v1466_v43 = vsel %vm1396_vm5, %v4150_v63, 0.0  ;;  %v4151_v21 = vmax.f32 %v2616_v9, 0.0  ;;  %v4152_v57 = vmax.f32 %v2622_v25, 0.0  ;;  %v1337_v52 = vadd.s32 %v3296_v48, %v1272_v6 }
 0x295   : > { %vm1399_vm8 = vcmp.lt.s32.totalorder %v1335_v14, 1000  ;;  %v1589_v37 = vadd.f32 %v1588_v26, %v1465_v28  ;;  %v1652_v31 = vadd.f32 %v1651_v7, %v1466_v43  ;;  %v1275_v49 = vadd.s32 104, %v4135_v40 }
 0x296   : > { %v1467_v53 = vsel %vm1397_vm6, %v4151_v21, 0.0  ;;  %v1468_v42 = vsel %vm1397_vm6, %v4152_v57, 0.0  ;;  %v4153_v58 = vmax.f32 %v2630_v44, 0.0  ;;  %v4154_v5 = vmax.f32 %v2638_v24, 0.0 }
 0x297   : > { %v1338_v39 = vadd.s32 %v3296_v48, %v1273_v18  ;;  %vm1400_vm9 = vcmp.lt.s32.totalorder %v1336_v61, 1000  ;;  %v1590_v9 = vadd.f32 %v1589_v37, %v1467_v53  ;;  %v1653_v1 = vadd.f32 %v1652_v31, %v1468_v42 }
 0x298   : > { %v1469_v27 = vsel %vm1398_vm7, %v4153_v58, 0.0  ;;  %v1470_v2 = vsel %vm1398_vm7, %v4154_v5, 0.0  ;;  %v1276_v25 = vadd.s32 112, %v4135_v40  ;;  %v4155_v6 = vmax.f32 %v2648_v17, 0.0 }
 0x299   : > { %v4156_v38 = vmax.f32 %v2654_v4, 0.0  ;;  %v1339_v14 = vadd.s32 %v3296_v48, %v1274_v30  ;;  %vm1401_vm10 = vcmp.lt.s32.totalorder %v1337_v52, 1000  ;;  %v1591_v44 = vadd.f32 %v1590_v9, %v1469_v27 }
 0x29a   : > { %v1471_v29 = vsel %vm1399_vm8, %v4155_v6, 0.0  ;;  %v1654_v12 = vadd.f32 %v1653_v1, %v1470_v2  ;;  %v1277_v24 = vadd.s32 120, %v4135_v40  ;;  %v4157_v32 = vmax.f32 %v2662_v23, 0.0 }
 0x29b   : > { %v1472_v3 = vsel %vm1399_vm8, %v4156_v38, 0.0  ;;  %v4158_v46 = vmax.f32 %v2670_v11, 0.0  ;;  %v1340_v63 = vadd.s32 %v3296_v48, %v1275_v49  ;;  %vm1402_vm11 = vcmp.lt.s32.totalorder %v1338_v39, 1000 }
 0x29c   : > { %v1473_v18 = vsel %vm1400_vm9, %v4157_v32, 0.0  ;;  %v1592_v17 = vadd.f32 %v1591_v44, %v1471_v29  ;;  %v1655_v43 = vadd.f32 %v1654_v12, %v1472_v3  ;;  %v1278_v4 = vadd.s32 128, %v4135_v40 }
 0x29d   : > { %v1474_v28 = vsel %vm1400_vm9, %v4158_v46, 0.0  ;;  %v4159_v61 = vmax.f32 %v2680_v8, 0.0  ;;  %v4160_v7 = vmax.f32 %v2686_v36, 0.0  ;;  %v1341_v21 = vadd.s32 %v3296_v48, %v1276_v25 }
 0x29e   : > { %vm1403_vm12 = vcmp.lt.s32.totalorder %v1339_v14, 1000  ;;  %v1593_v23 = vadd.f32 %v1592_v17, %v1473_v18  ;;  %v1656_v53 = vadd.f32 %v1655_v43, %v1474_v28  ;;  %v1279_v11 = vadd.s32 136, %v4135_v40 }
 0x29f   : > { %v1475_v26 = vsel %vm1401_vm10, %v4159_v61, 0.0  ;;  %v1476_v30 = vsel %vm1401_vm10, %v4160_v7, 0.0  ;;  %v4161_v57 = vmax.f32 %v2694_v33, 0.0  ;;  %v4162_v52 = vmax.f32 %v2702_v55, 0.0 }
 0x2a0   : > { %v1342_v31 = vadd.s32 %v3296_v48, %v1277_v24  ;;  %vm1404_vm13 = vcmp.lt.s32.totalorder %v1340_v63, 1000  ;;  %v1594_v8 = vadd.f32 %v1593_v23, %v1475_v26  ;;  %v1657_v49 = vadd.f32 %v1656_v53, %v1476_v30 }
 0x2a1   : > { %v1477_v42 = vsel %vm1402_vm11, %v4161_v57, 0.0  ;;  %v1478_v37 = vsel %vm1402_vm11, %v4162_v52, 0.0  ;;  %v1280_v36 = vadd.s32 144, %v4135_v40  ;;  %v4163_v58 = vmax.f32 %v2712_v51, 0.0 }
 0x2a2   : > { %v4164_v5 = vmax.f32 %v2718_v22, 0.0  ;;  %v1343_v39 = vadd.s32 %v3296_v48, %v1278_v4  ;;  %vm1405_vm14 = vcmp.lt.s32.totalorder %v1341_v21, 1000  ;;  %v1595_v33 = vadd.f32 %v1594_v8, %v1477_v42 }
 0x2a3   : > { %v1479_v27 = vsel %vm1403_vm12, %v4163_v58, 0.0  ;;  %v1658_v9 = vadd.f32 %v1657_v49, %v1478_v37  ;;  %v1281_v55 = vadd.s32 152, %v4135_v40  ;;  %v4165_v1 = vmax.f32 %v2726_v10, 0.0 }
 0x2a4   : > { %v1480_v2 = vsel %vm1403_vm12, %v4164_v5, 0.0  ;;  %v4166_v6 = vmax.f32 %v2734_v56, 0.0  ;;  %v1344_v38 = vadd.s32 %v3296_v48, %v1279_v11  ;;  %vm1406_vm15 = vcmp.lt.s32.totalorder %v1342_v31, 1000 }
 0x2a5   : > { %v1481_v25 = vsel %vm1404_vm13, %v4165_v1, 0.0  ;;  %v1596_v51 = vadd.f32 %v1595_v33, %v1479_v27  ;;  %v1659_v3 = vadd.f32 %v1658_v9, %v1480_v2  ;;  %v1282_v22 = vadd.s32 160, %v4135_v40 }
 0x2a6   : > { %v1482_v29 = vsel %vm1404_vm13, %v4166_v6, 0.0  ;;  %v4167_v14 = vmax.f32 %v2744_v35, 0.0  ;;  %v4168_v12 = vmax.f32 %v2750_v34, 0.0  ;;  %v1345_v32 = vadd.s32 %v3296_v48, %v1280_v36 }
 0x2a7   : > { %vm1407_vm0 = vcmp.lt.s32.totalorder %v1343_v39, 1000  ;;  %v1597_v10 = vadd.f32 %v1596_v51, %v1481_v25  ;;  %v1660_v18 = vadd.f32 %v1659_v3, %v1482_v29  ;;  %v1283_v56 = vadd.s32 168, %v4135_v40  ;;  %v4178_v39 = vld [vmem:[#allocation54_spill] sm:$0xff]  ;;  %v4180_v25 = vld [vmem:[#allocation56_spill] sm:$0xff] }
 0x2a8   : > { %v1483_v44 = vsel %vm1405_vm14, %v4167_v14, 0.0  ;;  %v1484_v24 = vsel %vm1405_vm14, %v4168_v12, 0.0  ;;  %v4169_v46 = vmax.f32 %v2758_v20, 0.0  ;;  %v4170_v63 = vmax.f32 %v2766_v45, 0.0  ;;  %v4184_v12 = vld [vmem:[#allocation60_spill] sm:$0xff] }
 0x2a9   : > { %v1346_v43 = vadd.s32 %v3296_v48, %v1281_v55  ;;  %vm1408_vm1 = vcmp.lt.s32.totalorder %v1344_v38, 1000  ;;  %v1598_v35 = vadd.f32 %v1597_v10, %v1483_v44  ;;  %v1661_v4 = vadd.f32 %v1660_v18, %v1484_v24  ;;  %v4182_v38 = vld [vmem:[#allocation58_spill] sm:$0xff] }
 0x2aa   : > { %v1485_v28 = vsel %vm1406_vm15, %v4169_v46, 0.0  ;;  %v1486_v17 = vsel %vm1406_vm15, %v4170_v63, 0.0  ;;  %v1284_v34 = vadd.s32 176, %v4135_v40  ;;  %v4171_v61 = vmax.f32 %v2776_v50, 0.0  ;;  %v4186_v10 = vld [vmem:[#allocation62_spill] sm:$0xff] }
 0x2ab   : > { %v4172_v7 = vmax.f32 %v2782_v41, 0.0  ;;  %v1347_v21 = vadd.s32 %v3296_v48, %v1282_v22  ;;  %vm1409_vm2 = vcmp.lt.s32.totalorder %v1345_v32, 1000  ;;  %v1599_v20 = vadd.f32 %v1598_v35, %v1485_v28 }
 0x2ac   : > { %v1487_v26 = vsel %vm1407_vm0, %v4171_v61, 0.0  ;;  %v1662_v23 = vadd.f32 %v1661_v4, %v1486_v17  ;;  %v1285_v45 = vadd.s32 184, %v4135_v40  ;;  %v4173_v53 = vmax.f32 %v2790_v16, 0.0 }
 0x2ad   : > { %v1488_v30 = vsel %vm1407_vm0, %v4172_v7, 0.0  ;;  %v4174_v57 = vmax.f32 %v2798_v60, 0.0  ;;  %v1348_v52 = vadd.s32 %v3296_v48, %v1283_v56  ;;  %vm1410_vm3 = vcmp.lt.s32.totalorder %v1346_v43, 1000  ;;  %v4188_v43 = vld [vmem:[#allocation64_spill] sm:$0xff] }
 0x2ae   : > { %v1489_v11 = vsel %vm1408_vm1, %v4173_v53, 0.0  ;;  %v1600_v50 = vadd.f32 %v1599_v20, %v1487_v26  ;;  %v1663_v37 = vadd.f32 %v1662_v23, %v1488_v30  ;;  %v1286_v41 = vadd.s32 192, %v4135_v40  ;;  %v4192_v23 = vld [vmem:[#allocation68_spill] sm:$0xff] }
 0x2af   : > { %v1490_v42 = vsel %vm1408_vm1, %v4174_v57, 0.0  ;;  %v4175_v31 = vmax.f32 %v2808_v62, 0.0  ;;  %v4176_v49 = vmax.f32 %v2814_v0, 0.0  ;;  %v1349_v58 = vadd.s32 %v3296_v48, %v1284_v34  ;;  %v4190_v34 = vld [vmem:[#allocation66_spill] sm:$0xff] }
 0x2b0   : > { %vm1411_vm4 = vcmp.lt.s32.totalorder %v1347_v21, 1000  ;;  %v1601_v16 = vadd.f32 %v1600_v50, %v1489_v11  ;;  %v1664_v27 = vadd.f32 %v1663_v37, %v1490_v42  ;;  %v1287_v60 = vadd.s32 200, %v4135_v40  ;;  %v4194_v11 = vld [vmem:[#allocation70_spill] sm:$0xff] }
 0x2b1   : > { %v1491_v8 = vsel %vm1409_vm2, %v4175_v31, 0.0  ;;  %v1492_v36 = vsel %vm1409_vm2, %v4176_v49, 0.0  ;;  %v4177_v5 = vmax.f32 %v2822_v15, 0.0  ;;  %v4179_v33 = vmax.f32 %v4178_v39, 0.0  ;;  %v4196_v31 = vld [vmem:[#allocation72_spill] sm:$0xff] }
 0x2b2   : > { %v1350_v55 = vadd.s32 %v3296_v48, %v1285_v45  ;;  %vm1412_vm5 = vcmp.lt.s32.totalorder %v1348_v52, 1000  ;;  %v1602_v62 = vadd.f32 %v1601_v16, %v1491_v8  ;;  %v1665_v1 = vadd.f32 %v1664_v27, %v1492_v36  ;;  %v4198_v36 = vld [vmem:[#allocation74_spill] sm:$0xff]  ;;  %v4200_v39 = vld [vmem:[#allocation76_spill] sm:$0xff] }
 0x2b3   : > { %v1493_v2 = vsel %vm1410_vm3, %v4177_v5, 0.0  ;;  %v1494_v9 = vsel %vm1410_vm3, %v4179_v33, 0.0  ;;  %v1288_v0 = vadd.s32 208, %v4135_v40  ;;  %v4181_v6 = vmax.f32 %v4180_v25, 0.0 }
 0x2b4   : > { %v4183_v51 = vmax.f32 %v4182_v38, 0.0  ;;  %v1351_v22 = vadd.s32 %v3296_v48, %v1286_v41  ;;  %vm1413_vm6 = vcmp.lt.s32.totalorder %v1349_v58, 1000  ;;  %v1603_v15 = vadd.f32 %v1602_v62, %v1493_v2  ;;  %v4204_v38 = vld [vmem:[#allocation80_spill] sm:$0xff] }
 0x2b5   : > { %v1495_v29 = vsel %vm1411_vm4, %v4181_v6, 0.0  ;;  %v1666_v14 = vadd.f32 %v1665_v1, %v1494_v9  ;;  %v1289_v44 = vadd.s32 216, %v4135_v40  ;;  %v4185_v24 = vmax.f32 %v4184_v12, 0.0 }
 0x2b6   : > { %v1496_v3 = vsel %vm1411_vm4, %v4183_v51, 0.0  ;;  %v4187_v18 = vmax.f32 %v4186_v10, 0.0  ;;  %v1352_v46 = vadd.s32 %v3296_v48, %v1287_v60  ;;  %vm1414_vm7 = vcmp.lt.s32.totalorder %v1350_v55, 1000  ;;  %v4202_v55 = vld [vmem:[#allocation78_spill] sm:$0xff]  ;;  %v4208_v10 = vld [vmem:[#allocation84_spill] sm:$0xff] }
 0x2b7   : > { %v1497_v32 = vsel %vm1412_vm5, %v4185_v24, 0.0  ;;  %v1604_v28 = vadd.f32 %v1603_v15, %v1495_v29  ;;  %v1667_v63 = vadd.f32 %v1666_v14, %v1496_v3  ;;  %v1290_v17 = vadd.s32 224, %v4135_v40 }
 0x2b8   : > { %v1498_v56 = vsel %vm1412_vm5, %v4187_v18, 0.0  ;;  %v4189_v35 = vmax.f32 %v4188_v43, 0.0  ;;  %v4191_v61 = vmax.f32 %v4190_v34, 0.0  ;;  %v1353_v7 = vadd.s32 %v3296_v48, %v1288_v0  ;;  %v4212_v34 = vld [vmem:[#allocation88_spill] sm:$0xff] }
 0x2b9   : > { %vm1415_vm8 = vcmp.lt.s32.totalorder %v1351_v22, 1000  ;;  %v1605_v30 = vadd.f32 %v1604_v28, %v1497_v32  ;;  %v1668_v21 = vadd.f32 %v1667_v63, %v1498_v56  ;;  %v1291_v20 = vadd.s32 232, %v4135_v40  ;;  %v4206_v22 = vld [vmem:[#allocation82_spill] sm:$0xff] }
 0x2ba   : > { %v1499_v4 = vsel %vm1413_vm6, %v4189_v35, 0.0  ;;  %v1500_v26 = vsel %vm1413_vm6, %v4191_v61, 0.0  ;;  %v4193_v45 = vmax.f32 %v4192_v23, 0.0  ;;  %v4195_v57 = vmax.f32 %v4194_v11, 0.0  ;;  %v4216_v11 = vld [vmem:[#allocation92_spill] sm:$0xff] }
 0x2bb   : > { %v1354_v52 = vadd.s32 %v3296_v48, %v1289_v44  ;;  %vm1416_vm9 = vcmp.lt.s32.totalorder %v1352_v46, 1000  ;;  %v1606_v50 = vadd.f32 %v1605_v30, %v1499_v4  ;;  %v1669_v37 = vadd.f32 %v1668_v21, %v1500_v26  ;;  %v4210_v46 = vld [vmem:[#allocation86_spill] sm:$0xff] }
 0x2bc   : > { %v1501_v53 = vsel %vm1414_vm7, %v4193_v45, 0.0  ;;  %v1502_v42 = vsel %vm1414_vm7, %v4195_v57, 0.0  ;;  %v1292_v41 = vadd.s32 240, %v4135_v40  ;;  %v4197_v8 = vmax.f32 %v4196_v31, 0.0 }
 0x2bd   : > { %v4199_v58 = vmax.f32 %v4198_v36, 0.0  ;;  %v1355_v27 = vadd.s32 %v3296_v48, %v1290_v17  ;;  %vm1417_vm10 = vcmp.lt.s32.totalorder %v1353_v7, 1000  ;;  %v1607_v60 = vadd.f32 %v1606_v50, %v1501_v53  ;;  %v4214_v7 = vld [vmem:[#allocation90_spill] sm:$0xff] }
 0x2be   : > { %v1503_v49 = vsel %vm1415_vm8, %v4197_v8, 0.0  ;;  %v1670_v5 = vadd.f32 %v1669_v37, %v1502_v42  ;;  %v1293_v2 = vadd.s32 248, %v4135_v40  ;;  %v4201_v33 = vmax.f32 %v4200_v39, 0.0 }
 0x2bf   : > { %v1504_v16 = vsel %vm1415_vm8, %v4199_v58, 0.0  ;;  %v4203_v62 = vmax.f32 %v4202_v55, 0.0  ;;  %v1356_v0 = vadd.s32 %v3296_v48, %v1291_v20  ;;  %vm1418_vm11 = vcmp.lt.s32.totalorder %v1354_v52, 1000  ;;  %v4218_v52 = vld [vmem:[#allocation94_spill] sm:$0xff] }
 0x2c0   : > { %v1505_v9 = vsel %vm1416_vm9, %v4201_v33, 0.0  ;;  %v1608_v25 = vadd.f32 %v1607_v60, %v1503_v49  ;;  %v1671_v6 = vadd.f32 %v1670_v5, %v1504_v16  ;;  %v1294_v29 = vadd.s32 256, %v4135_v40 }
 0x2c1   : > { %v1506_v1 = vsel %vm1416_vm9, %v4203_v62, 0.0  ;;  %v4205_v51 = vmax.f32 %v4204_v38, 0.0  ;;  %v4207_v15 = vmax.f32 %v4206_v22, 0.0  ;;  %v1357_v44 = vadd.s32 %v3296_v48, %v1292_v41  ;;  %v4226_v38 = vld [vmem:[#allocation15_spill] sm:$0xff] }
 0x2c2   : > { %vm1419_vm12 = vcmp.lt.s32.totalorder %v1355_v27, 1000  ;;  %v1609_v12 = vadd.f32 %v1608_v25, %v1505_v9  ;;  %v1672_v24 = vadd.f32 %v1671_v6, %v1506_v1  ;;  %v1295_v32 = vadd.s32 264, %v4135_v40  ;;  %v4224_v25 = vld [vmem:[#allocation13_spill] sm:$0xff] }
 0x2c3   : > { %v1507_v3 = vsel %vm1417_vm10, %v4205_v51, 0.0  ;;  %v1508_v14 = vsel %vm1417_vm10, %v4207_v15, 0.0  ;;  %v4209_v18 = vmax.f32 %v4208_v10, 0.0  ;;  %v4211_v28 = vmax.f32 %v4210_v46, 0.0 }
 0x2c4   : > { %v1358_v17 = vadd.s32 %v3296_v48, %v1293_v2  ;;  %vm1420_vm13 = vcmp.lt.s32.totalorder %v1356_v0, 1000  ;;  %v1610_v43 = vadd.f32 %v1609_v12, %v1507_v3  ;;  %v1673_v35 = vadd.f32 %v1672_v24, %v1508_v14  ;;  %v4228_v14 = vld [vmem:[#allocation17_spill] sm:$0xff]  ;;  %v4230_v24 = vld [vmem:[#allocation18_spill] sm:$0xff] }
 0x2c5   : > { %v1509_v56 = vsel %vm1418_vm11, %v4209_v18, 0.0  ;;  %v1510_v63 = vsel %vm1418_vm11, %v4211_v28, 0.0  ;;  %v1296_v4 = vadd.s32 272, %v4135_v40  ;;  %v4213_v61 = vmax.f32 %v4212_v34, 0.0 }
 0x2c6   : > { %v4215_v30 = vmax.f32 %v4214_v7, 0.0  ;;  %v1359_v20 = vadd.s32 %v3296_v48, %v1294_v29  ;;  %vm1421_vm14 = vcmp.lt.s32.totalorder %v1357_v44, 1000  ;;  %v1611_v23 = vadd.f32 %v1610_v43, %v1509_v56 }
 0x2c7   : > { %v1511_v26 = vsel %vm1419_vm12, %v4213_v61, 0.0  ;;  %v1674_v45 = vadd.f32 %v1673_v35, %v1510_v63  ;;  %v1297_v53 = vadd.s32 280, %v4135_v40  ;;  %v4217_v57 = vmax.f32 %v4216_v11, 0.0  ;;  %v4232_v63 = vld [vmem:[#allocation19_spill] sm:$0xff]  ;;  %v4234_v35 = vld [vmem:[#allocation20_spill] sm:$0xff] }
 0x2c8   : > { %v1512_v21 = vsel %vm1419_vm12, %v4215_v30, 0.0  ;;  %v4219_v50 = vmax.f32 %v4218_v52, 0.0  ;;  %v1360_v41 = vadd.s32 %v3296_v48, %v1295_v32  ;;  %vm1422_vm15 = vcmp.lt.s32.totalorder %v1358_v17, 1000 }
 0x2c9   : > { %v1513_v42 = vsel %vm1420_vm13, %v4217_v57, 0.0  ;;  %v1612_v31 = vadd.f32 %v1611_v23, %v1511_v26  ;;  %v1675_v8 = vadd.f32 %v1674_v45, %v1512_v21  ;;  %v1298_v49 = vadd.s32 288, %v4135_v40  ;;  %v4236_v21 = vld [vmem:[#allocation21_spill] sm:$0xff]  ;;  %v4238_v45 = vld [vmem:[#allocation22_spill] sm:$0xff] }
 0x2ca   : > { %v1514_v37 = vsel %vm1420_vm13, %v4219_v50, 0.0  ;;  %v4220_v36 = vmax.f32 %v3000_v47, 0.0  ;;  %v4221_v16 = vmax.f32 %v3006_v13, 0.0  ;;  %v1361_v60 = vadd.s32 %v3296_v48, %v1296_v4 }
 0x2cb   : > { %vm1423_vm0 = vcmp.lt.s32.totalorder %v1359_v20, 1000  ;;  %v1613_v5 = vadd.f32 %v1612_v31, %v1513_v42  ;;  %v1676_v2 = vadd.f32 %v1675_v8, %v1514_v37  ;;  %v1299_v39 = vadd.s32 296, %v4135_v40  ;;  %v4240_v37 = vld [vmem:[#allocation23_spill] sm:$0xff]  ;;  %v4242_v8 = vld [vmem:[#allocation24_spill] sm:$0xff] }
 0x2cc   : > { %v1515_v58 = vsel %vm1421_vm14, %v4220_v36, 0.0  ;;  %v1516_v27 = vsel %vm1421_vm14, %v4221_v16, 0.0  ;;  %v4222_v33 = vmax.f32 %v3014_v19, 0.0  ;;  %v4223_v55 = vmax.f32 %v3022_v54, 0.0 }
 0x2cd   : > { %v1362_v1 = vadd.s32 %v3296_v48, %v1297_v53  ;;  %vm1424_vm1 = vcmp.lt.s32.totalorder %v1360_v41, 1000  ;;  %v1614_v47 = vadd.f32 %v1613_v5, %v1515_v58  ;;  %v1677_v0 = vadd.f32 %v1676_v2, %v1516_v27  ;;  %v4244_v5 = vld [vmem:[#allocation25_spill] sm:$0xff] }
 0x2ce   : > { %v1517_v9 = vsel %vm1422_vm15, %v4222_v33, 0.0  ;;  %v1518_v62 = vsel %vm1422_vm15, %v4223_v55, 0.0  ;;  %v1300_v13 = vadd.s32 304, %v4135_v40  ;;  %v4225_v6 = vmax.f32 %v4224_v25, 0.0  ;;  %v4246_v33 = vld [vmem:[#allocation26_spill] sm:$0xff] }
 0x2cf   : > { %v4227_v51 = vmax.f32 %v4226_v38, 0.0  ;;  %v1363_v22 = vadd.s32 %v3296_v48, %v1298_v49  ;;  %vm1425_vm2 = vcmp.lt.s32.totalorder %v1361_v60, 1000  ;;  %v1615_v19 = vadd.f32 %v1614_v47, %v1517_v9 }
 0x2d0   : > { %v1519_v29 = vsel %vm1423_vm0, %v4225_v6, 0.0  ;;  %v1678_v15 = vadd.f32 %v1677_v0, %v1518_v62  ;;  %v1301_v54 = vadd.s32 312, %v4135_v40  ;;  %v4229_v44 = vmax.f32 %v4228_v14, 0.0 }
 0x2d1   : > { %v1520_v3 = vsel %vm1423_vm0, %v4227_v51, 0.0  ;;  %v4231_v32 = vmax.f32 %v4230_v24, 0.0  ;;  %v1364_v18 = vadd.s32 %v3296_v48, %v1299_v39  ;;  %vm1426_vm3 = vcmp.lt.s32.totalorder %v1362_v1, 1000 }
 0x2d2   : > { %v1521_v12 = vsel %vm1424_vm1, %v4229_v44, 0.0  ;;  %v1616_v56 = vadd.f32 %v1615_v19, %v1519_v29  ;;  %v1679_v46 = vadd.f32 %v1678_v15, %v1520_v3  ;;  %v1302_v28 = vadd.s32 320, %v4135_v40  ;;  %v4250_v29 = vld [vmem:[#allocation28_spill] sm:$0xff] }
 0x2d3   : > { %v1522_v10 = vsel %vm1424_vm1, %v4231_v32, 0.0  ;;  %v4233_v17 = vmax.f32 %v4232_v63, 0.0  ;;  %v4235_v4 = vmax.f32 %v4234_v35, 0.0  ;;  %v1365_v61 = vadd.s32 %v3296_v48, %v1300_v13  ;;  %v4248_v13 = vld [vmem:[#allocation27_spill] sm:$0xff] }
 0x2d4   : > { %vm1427_vm4 = vcmp.lt.s32.totalorder %v1363_v22, 1000  ;;  %v1617_v26 = vadd.f32 %v1616_v56, %v1521_v12  ;;  %v1680_v7 = vadd.f32 %v1679_v46, %v1522_v10  ;;  %v1303_v30 = vadd.s32 328, %v4135_v40  ;;  %v4254_v12 = vld [vmem:[#allocation30_spill] sm:$0xff] }
 0x2d5   : > { %v1523_v43 = vsel %vm1425_vm2, %v4233_v17, 0.0  ;;  %v1524_v34 = vsel %vm1425_vm2, %v4235_v4, 0.0  ;;  %v4237_v20 = vmax.f32 %v4236_v21, 0.0  ;;  %v4239_v53 = vmax.f32 %v4238_v45, 0.0 }
 0x2d6   : > { %v1366_v57 = vadd.s32 %v3296_v48, %v1301_v54  ;;  %vm1428_vm5 = vcmp.lt.s32.totalorder %v1364_v18, 1000  ;;  %v1618_v42 = vadd.f32 %v1617_v26, %v1523_v43  ;;  %v1681_v52 = vadd.f32 %v1680_v7, %v1524_v34  ;;  %v4252_v54 = vld [vmem:[#allocation29_spill] sm:$0xff]  ;;  %v4258_v43 = vld [vmem:[#allocation32_spill] sm:$0xff] }
 0x2d7   : > { %v1525_v23 = vsel %vm1426_vm3, %v4237_v20, 0.0  ;;  %v1526_v11 = vsel %vm1426_vm3, %v4239_v53, 0.0  ;;  %v1304_v50 = vadd.s32 336, %v4135_v40  ;;  %v4241_v41 = vmax.f32 %v4240_v37, 0.0 }
 0x2d8   : > { %v4243_v49 = vmax.f32 %v4242_v8, 0.0  ;;  %v1367_v58 = vadd.s32 %v3296_v48, %v1302_v28  ;;  %vm1429_vm6 = vcmp.lt.s32.totalorder %v1365_v61, 1000  ;;  %v1619_v16 = vadd.f32 %v1618_v42, %v1525_v23  ;;  %v4256_v28 = vld [vmem:[#allocation31_spill] sm:$0xff]  ;;  %v4262_v23 = vld [vmem:[#allocation34_spill] sm:$0xff] }
 0x2d9   : > { %v1527_v31 = vsel %vm1427_vm4, %v4241_v41, 0.0  ;;  %v1682_v27 = vadd.f32 %v1681_v52, %v1526_v11  ;;  %v1305_v60 = vadd.s32 344, %v4135_v40  ;;  %v4245_v2 = vmax.f32 %v4244_v5, 0.0 }
 0x2da   : > { %v1528_v36 = vsel %vm1427_vm4, %v4243_v49, 0.0  ;;  %v4247_v9 = vmax.f32 %v4246_v33, 0.0  ;;  %v1368_v62 = vadd.s32 %v3296_v48, %v1303_v30  ;;  %vm1430_vm7 = vcmp.lt.s32.totalorder %v1366_v57, 1000  ;;  %v4260_v30 = vld [vmem:[#allocation33_spill] sm:$0xff] }
 0x2db   : > { %v1529_v39 = vsel %vm1428_vm5, %v4245_v2, 0.0  ;;  %v1620_v1 = vadd.f32 %v1619_v16, %v1527_v31  ;;  %v1683_v47 = vadd.f32 %v1682_v27, %v1528_v36  ;;  %v1306_v0 = vadd.s32 352, %v4135_v40  ;;  %v4266_v31 = vld [vmem:[#allocation36_spill] sm:$0xff] }
 0x2dc   : > { %v1530_v55 = vsel %vm1428_vm5, %v4247_v9, 0.0  ;;  %v4249_v25 = vmax.f32 %v4248_v13, 0.0  ;;  %v4251_v38 = vmax.f32 %v4250_v29, 0.0  ;;  %v1369_v3 = vadd.s32 %v3296_v48, %v1304_v50  ;;  %v4264_v50 = vld [vmem:[#allocation35_spill] sm:$0xff] }
 0x2dd   : > { %vm1431_vm8 = vcmp.lt.s32.totalorder %v1367_v58, 1000  ;;  %v1621_v22 = vadd.f32 %v1620_v1, %v1529_v39  ;;  %v1684_v19 = vadd.f32 %v1683_v47, %v1530_v55  ;;  %v1307_v15 = vadd.s32 360, %v4135_v40  ;;  %v4270_v39 = vld [vmem:[#allocation38_spill] sm:$0xff] }
 0x2de   : > { %v1531_v6 = vsel %vm1429_vm6, %v4249_v25, 0.0  ;;  %v1532_v51 = vsel %vm1429_vm6, %v4251_v38, 0.0  ;;  %v4253_v14 = vmax.f32 %v4252_v54, 0.0  ;;  %v4255_v24 = vmax.f32 %v4254_v12, 0.0 }
 0x2df   : > { %v1370_v10 = vadd.s32 %v3296_v48, %v1305_v60  ;;  %vm1432_vm9 = vcmp.lt.s32.totalorder %v1368_v62, 1000  ;;  %v1622_v18 = vadd.f32 %v1621_v22, %v1531_v6  ;;  %v1685_v56 = vadd.f32 %v1684_v19, %v1532_v51  ;;  %v4268_v60 = vld [vmem:[#allocation37_spill] sm:$0xff]  ;;  %v4274_v6 = vld [vmem:[#allocation40_spill] sm:$0xff] }
 0x2e0   : > { %v1533_v44 = vsel %vm1430_vm7, %v4253_v14, 0.0  ;;  %v1534_v32 = vsel %vm1430_vm7, %v4255_v24, 0.0  ;;  %v1308_v46 = vadd.s32 368, %v4135_v40  ;;  %v4257_v63 = vmax.f32 %v4256_v28, 0.0 }
 0x2e1   : > { %v4259_v35 = vmax.f32 %v4258_v43, 0.0  ;;  %v1371_v34 = vadd.s32 %v3296_v48, %v1306_v0  ;;  %vm1433_vm10 = vcmp.lt.s32.totalorder %v1369_v3, 1000  ;;  %v1623_v61 = vadd.f32 %v1622_v18, %v1533_v44  ;;  %v4272_v0 = vld [vmem:[#allocation39_spill] sm:$0xff]  ;;  %v4278_v44 = vld [vmem:[#allocation42_spill] sm:$0xff] }
 0x2e2   : > { %v1535_v17 = vsel %vm1431_vm8, %v4257_v63, 0.0  ;;  %v1686_v26 = vadd.f32 %v1685_v56, %v1534_v32  ;;  %v1309_v7 = vadd.s32 376, %v4135_v40  ;;  %v4261_v21 = vmax.f32 %v4260_v30, 0.0 }
 0x2e3   : > { %v1536_v4 = vsel %vm1431_vm8, %v4259_v35, 0.0  ;;  %v4263_v45 = vmax.f32 %v4262_v23, 0.0  ;;  %v1372_v11 = vadd.s32 %v3296_v48, %v1307_v15  ;;  %vm1434_vm11 = vcmp.lt.s32.totalorder %v1370_v10, 1000  ;;  %v4276_v15 = vld [vmem:[#allocation41_spill] sm:$0xff] }
 0x2e4   : > { %v1537_v20 = vsel %vm1432_vm9, %v4261_v21, 0.0  ;;  %v1624_v57 = vadd.f32 %v1623_v61, %v1535_v17  ;;  %v1687_v42 = vadd.f32 %v1686_v26, %v1536_v4  ;;  %v1310_v52 = vadd.s32 384, %v4135_v40  ;;  %v4282_v17 = vld [vmem:[#allocation44_spill] sm:$0xff] }
 0x2e5   : > { %v1538_v53 = vsel %vm1432_vm9, %v4263_v45, 0.0  ;;  %v4265_v37 = vmax.f32 %v4264_v50, 0.0  ;;  %v4267_v8 = vmax.f32 %v4266_v31, 0.0  ;;  %v1373_v36 = vadd.s32 %v3296_v48, %v1308_v46  ;;  %v4280_v46 = vld [vmem:[#allocation43_spill] sm:$0xff] }
 0x2e6   : > { %vm1435_vm12 = vcmp.lt.s32.totalorder %v1371_v34, 1000  ;;  %v1625_v58 = vadd.f32 %v1624_v57, %v1537_v20  ;;  %v1688_v16 = vadd.f32 %v1687_v42, %v1538_v53  ;;  %v1311_v27 = vadd.s32 392, %v4135_v40  ;;  %v4286_v20 = vld [vmem:[#allocation46_spill] sm:$0xff] }
 0x2e7   : > { %v1539_v41 = vsel %vm1433_vm10, %v4265_v37, 0.0  ;;  %v1540_v49 = vsel %vm1433_vm10, %v4267_v8, 0.0  ;;  %v4269_v5 = vmax.f32 %v4268_v60, 0.0  ;;  %v4271_v33 = vmax.f32 %v4270_v39, 0.0 }
 0x2e8   : > { %v1374_v55 = vadd.s32 %v3296_v48, %v1309_v7  ;;  %vm1436_vm13 = vcmp.lt.s32.totalorder %v1372_v11, 1000  ;;  %v1626_v62 = vadd.f32 %v1625_v58, %v1539_v41  ;;  %v1689_v1 = vadd.f32 %v1688_v16, %v1540_v49  ;;  %v4284_v7 = vld [vmem:[#allocation45_spill] sm:$0xff]  ;;  %v4290_v41 = vld [vmem:[#allocation48_spill] sm:$0xff] }
 0x2e9   : > { %v1541_v2 = vsel %vm1434_vm11, %v4269_v5, 0.0  ;;  %v1542_v9 = vsel %vm1434_vm11, %v4271_v33, 0.0  ;;  %v1312_v47 = vadd.s32 400, %v4135_v40  ;;  %v4273_v13 = vmax.f32 %v4272_v0, 0.0 }
 0x2ea   : > { %v4275_v29 = vmax.f32 %v4274_v6, 0.0  ;;  %v1375_v51 = vadd.s32 %v3296_v48, %v1310_v52  ;;  %vm1437_vm14 = vcmp.lt.s32.totalorder %v1373_v36, 1000  ;;  %v1627_v3 = vadd.f32 %v1626_v62, %v1541_v2  ;;  %v4288_v52 = vld [vmem:[#allocation47_spill] sm:$0xff]  ;;  %v4294_v2 = vld [vmem:[#allocation50_spill] sm:$0xff] }
 0x2eb   : > { %v1543_v25 = vsel %vm1435_vm12, %v4273_v13, 0.0  ;;  %v1690_v22 = vadd.f32 %v1689_v1, %v1542_v9  ;;  %v1313_v19 = vadd.s32 408, %v4135_v40  ;;  %v4277_v54 = vmax.f32 %v4276_v15, 0.0 }
 0x2ec   : > { %v1544_v38 = vsel %vm1435_vm12, %v4275_v29, 0.0  ;;  %v4279_v12 = vmax.f32 %v4278_v44, 0.0  ;;  %v1376_v32 = vadd.s32 %v3296_v48, %v1311_v27  ;;  %vm1438_vm15 = vcmp.lt.s32.totalorder %v1374_v55, 1000  ;;  %v4292_v27 = vld [vmem:[#allocation49_spill] sm:$0xff] }
 0x2ed   : > { %v1545_v14 = vsel %vm1436_vm13, %v4277_v54, 0.0  ;;  %v1628_v10 = vadd.f32 %v1627_v3, %v1543_v25  ;;  %v1691_v18 = vadd.f32 %v1690_v22, %v1544_v38  ;;  %v1314_v56 = vadd.s32 416, %v4135_v40  ;;  %v4298_v25 = vld [vmem:[#allocation52_spill] sm:$0xff] }
 0x2ee   : > { %v1546_v24 = vsel %vm1436_vm13, %v4279_v12, 0.0  ;;  %v4281_v28 = vmax.f32 %v4280_v46, 0.0  ;;  %v4283_v43 = vmax.f32 %v4282_v17, 0.0  ;;  %v1377_v4 = vadd.s32 %v3296_v48, %v1312_v47  ;;  %v4296_v47 = vld [vmem:[#allocation51_spill] sm:$0xff] }
 0x2ef   : > { %vm1439_vm0 = vcmp.lt.s32.totalorder %v1375_v51, 1000  ;;  %v1629_v34 = vadd.f32 %v1628_v10, %v1545_v14  ;;  %v1692_v61 = vadd.f32 %v1691_v18, %v1546_v24  ;;  %v1315_v26 = vadd.s32 424, %v4135_v40  ;;  %v4302_v14 = vld [vmem:[#allocation55_spill] sm:$0xff] }
 0x2f0   : > { %v1547_v63 = vsel %vm1437_vm14, %v4281_v28, 0.0  ;;  %v1548_v35 = vsel %vm1437_vm14, %v4283_v43, 0.0  ;;  %v4285_v30 = vmax.f32 %v4284_v7, 0.0  ;;  %v4287_v23 = vmax.f32 %v4286_v20, 0.0 }
 0x2f1   : > { %v1378_v53 = vadd.s32 %v3296_v48, %v1313_v19  ;;  %vm1440_vm1 = vcmp.lt.s32.totalorder %v1376_v32, 1000  ;;  %v1630_v11 = vadd.f32 %v1629_v34, %v1547_v63  ;;  %v1693_v57 = vadd.f32 %v1692_v61, %v1548_v35  ;;  %v4300_v19 = vld [vmem:[#allocation53_spill] sm:$0xff]  ;;  %v4306_v63 = vld [vmem:[#allocation59_spill] sm:$0xff] }
 0x2f2   : > { %v1549_v21 = vsel %vm1438_vm15, %v4285_v30, 0.0  ;;  %v1550_v45 = vsel %vm1438_vm15, %v4287_v23, 0.0  ;;  %v1316_v42 = vadd.s32 432, %v4135_v40  ;;  %v4289_v50 = vmax.f32 %v4288_v52, 0.0 }
 0x2f3   : > { %v4291_v31 = vmax.f32 %v4290_v41, 0.0  ;;  %v1379_v49 = vadd.s32 %v3296_v48, %v1314_v56  ;;  %vm1441_vm2 = vcmp.lt.s32.totalorder %v1377_v4, 1000  ;;  %v1631_v36 = vadd.f32 %v1630_v11, %v1549_v21  ;;  %v4304_v56 = vld [vmem:[#allocation57_spill] sm:$0xff]  ;;  %v4310_v21 = vld [vmem:[#allocation63_spill] sm:$0xff] }
 0x2f4   : > { %v1551_v37 = vsel %vm1439_vm0, %v4289_v50, 0.0  ;;  %v1694_v58 = vadd.f32 %v1693_v57, %v1550_v45  ;;  %v1317_v16 = vadd.s32 440, %v4135_v40  ;;  %v4293_v60 = vmax.f32 %v4292_v27, 0.0 }
 0x2f5   : > { %v1552_v8 = vsel %vm1439_vm0, %v4291_v31, 0.0  ;;  %v4295_v39 = vmax.f32 %v4294_v2, 0.0  ;;  %v1380_v9 = vadd.s32 %v3296_v48, %v1315_v26  ;;  %vm1442_vm3 = vcmp.lt.s32.totalorder %v1378_v53, 1000  ;;  %v4308_v26 = vld [vmem:[#allocation61_spill] sm:$0xff] }
 0x2f6   : > { %v1553_v5 = vsel %vm1440_vm1, %v4293_v60, 0.0  ;;  %v1632_v55 = vadd.f32 %v1631_v36, %v1551_v37  ;;  %v1695_v62 = vadd.f32 %v1694_v58, %v1552_v8  ;;  %v1318_v1 = vadd.s32 448, %v4135_v40  ;;  %v4314_v37 = vld [vmem:[#allocation67_spill] sm:$0xff] }
 0x2f7   : > { %v1554_v33 = vsel %vm1440_vm1, %v4295_v39, 0.0  ;;  %v4297_v0 = vmax.f32 %v4296_v47, 0.0  ;;  %v4299_v6 = vmax.f32 %v4298_v25, 0.0  ;;  %v1381_v38 = vadd.s32 %v3296_v48, %v1316_v42  ;;  %v4312_v42 = vld [vmem:[#allocation65_spill] sm:$0xff] }
 0x2f8   : > { %vm1443_vm4 = vcmp.lt.s32.totalorder %v1379_v49, 1000  ;;  %v1633_v51 = vadd.f32 %v1632_v55, %v1553_v5  ;;  %v1696_v3 = vadd.f32 %v1695_v62, %v1554_v33  ;;  %v1319_v22 = vadd.s32 456, %v4135_v40  ;;  %v4318_v5 = vld [vmem:[#allocation71_spill] sm:$0xff] }
 0x2f9   : > { %v1555_v13 = vsel %vm1441_vm2, %v4297_v0, 0.0  ;;  %v1556_v29 = vsel %vm1441_vm2, %v4299_v6, 0.0  ;;  %v4301_v15 = vmax.f32 %v4300_v19, 0.0  ;;  %v4303_v44 = vmax.f32 %v4302_v14, 0.0 }
 0x2fa   : > { %v1382_v24 = vadd.s32 %v3296_v48, %v1317_v16  ;;  %vm1444_vm5 = vcmp.lt.s32.totalorder %v1380_v9, 1000  ;;  %v1634_v32 = vadd.f32 %v1633_v51, %v1555_v13  ;;  %v1697_v10 = vadd.f32 %v1696_v3, %v1556_v29  ;;  %v4316_v16 = vld [vmem:[#allocation69_spill] sm:$0xff]  ;;  %v4322_v13 = vld [vmem:[#allocation75_spill] sm:$0xff] }
 0x2fb   : > { %v1557_v54 = vsel %vm1442_vm3, %v4301_v15, 0.0  ;;  %v1558_v12 = vsel %vm1442_vm3, %v4303_v44, 0.0  ;;  %v1320_v18 = vadd.s32 464, %v4135_v40  ;;  %v4305_v46 = vmax.f32 %v4304_v56, 0.0 }
 0x2fc   : > { %v4307_v17 = vmax.f32 %v4306_v63, 0.0  ;;  %v1383_v35 = vadd.s32 %v3296_v48, %v1318_v1  ;;  %vm1445_vm6 = vcmp.lt.s32.totalorder %v1381_v38, 1000  ;;  %v1635_v4 = vadd.f32 %v1634_v32, %v1557_v54  ;;  %v4320_v1 = vld [vmem:[#allocation73_spill] sm:$0xff]  ;;  %v4326_v54 = vld [vmem:[#allocation79_spill] sm:$0xff] }
 0x2fd   : > { %v1559_v28 = vsel %vm1443_vm4, %v4305_v46, 0.0  ;;  %v1698_v34 = vadd.f32 %v1697_v10, %v1558_v12  ;;  %v1321_v61 = vadd.s32 472, %v4135_v40  ;;  %v4309_v7 = vmax.f32 %v4308_v26, 0.0  ;;  %v4328_v10 = vld [vmem:[#allocation81_spill] sm:$0xff]  ;;  %v4330_v46 = vld [vmem:[#allocation83_spill] sm:$0xff] }
 0x2fe   : > { %v1560_v43 = vsel %vm1443_vm4, %v4307_v17, 0.0  ;;  %v4311_v20 = vmax.f32 %v4310_v21, 0.0  ;;  %v1384_v45 = vadd.s32 %v3296_v48, %v1319_v22  ;;  %vm1446_vm7 = vcmp.lt.s32.totalorder %v1382_v24, 1000  ;;  %v4324_v22 = vld [vmem:[#allocation77_spill] sm:$0xff] }
 0x2ff   : > { %v1561_v30 = vsel %vm1444_vm5, %v4309_v7, 0.0  ;;  %v1636_v53 = vadd.f32 %v1635_v4, %v1559_v28  ;;  %v1699_v11 = vadd.f32 %v1698_v34, %v1560_v43  ;;  %v1322_v57 = vadd.s32 480, %v4135_v40 }
 0x300   : > { %v1562_v23 = vsel %vm1444_vm5, %v4311_v20, 0.0  ;;  %v4313_v52 = vmax.f32 %v4312_v42, 0.0  ;;  %v4315_v41 = vmax.f32 %v4314_v37, 0.0  ;;  %v1385_v8 = vadd.s32 %v3296_v48, %v1320_v18  ;;  %v4340_v37 = vld [vmem:[#allocation93_spill] sm:$0xff] }
 0x301   : > { %vm1447_vm8 = vcmp.lt.s32.totalorder %v1383_v35, 1000  ;;  %v1637_v49 = vadd.f32 %v1636_v53, %v1561_v30  ;;  %v1700_v36 = vadd.f32 %v1699_v11, %v1562_v23  ;;  %v1323_v58 = vadd.s32 488, %v4135_v40  ;;  %v4332_v35 = vld [vmem:[#allocation85_spill] sm:$0xff]  ;;  %v4338_v11 = vld [vmem:[#allocation91_spill] sm:$0xff] }
 0x302   : > { %v1563_v50 = vsel %vm1445_vm6, %v4313_v52, 0.0  ;;  %v1564_v31 = vsel %vm1445_vm6, %v4315_v41, 0.0  ;;  %v4317_v27 = vmax.f32 %v4316_v16, 0.0  ;;  %v4319_v2 = vmax.f32 %v4318_v5, 0.0  ;;  %v4336_v23 = vld [vmem:[#allocation89_spill] sm:$0xff] }
 0x303   : > { %v1386_v33 = vadd.s32 %v3296_v48, %v1321_v61  ;;  %vm1448_vm9 = vcmp.lt.s32.totalorder %v1384_v45, 1000  ;;  %v1638_v9 = vadd.f32 %v1637_v49, %v1563_v50  ;;  %v1701_v55 = vadd.f32 %v1700_v36, %v1564_v31  ;;  %v4334_v61 = vld [vmem:[#allocation87_spill] sm:$0xff] }
 0x304   : > { %v1565_v60 = vsel %vm1446_vm7, %v4317_v27, 0.0  ;;  %v1566_v39 = vsel %vm1446_vm7, %v4319_v2, 0.0  ;;  %v1324_v62 = vadd.s32 496, %v4135_v40  ;;  %v4321_v47 = vmax.f32 %v4320_v1, 0.0  ;;  %v4349_v1 = vld [vmem:[#allocation98_spill] sm:$0xff] }
 0x305   : > { %v4323_v25 = vmax.f32 %v4322_v13, 0.0  ;;  %v1387_v29 = vadd.s32 %v3296_v48, %v1322_v57  ;;  %vm1449_vm10 = vcmp.lt.s32.totalorder %v1385_v8, 1000  ;;  %v1639_v38 = vadd.f32 %v1638_v9, %v1565_v60  ;;  %v4342_v8 = vld [vmem:[#allocation95_spill] sm:$0xff]  ;;  %v4345_v60 = vld [vmem:[#allocation96_spill] sm:$0xff]  ;;  %v4347_v9 = vld [vmem:[#allocation97_spill] sm:$0xff] }
 0x306   : > { %v1567_v0 = vsel %vm1447_vm8, %v4321_v47, 0.0  ;;  %v1702_v51 = vadd.f32 %v1701_v55, %v1566_v39  ;;  %v1325_v3 = vadd.s32 504, %v4135_v40  ;;  %v4325_v19 = vmax.f32 %v4324_v22, 0.0 }
 0x307   : > { %v1568_v6 = vsel %vm1447_vm8, %v4323_v25, 0.0  ;;  %v4327_v14 = vmax.f32 %v4326_v54, 0.0  ;;  %v1388_v12 = vadd.s32 %v3296_v48, %v1323_v58  ;;  %vm1450_vm11 = vcmp.lt.s32.totalorder %v1386_v33, 1000 }
 0x308   : > { %v1569_v15 = vsel %vm1448_vm9, %v4325_v19, 0.0  ;;  %v1640_v24 = vadd.f32 %v1639_v38, %v1567_v0  ;;  %v1703_v32 = vadd.f32 %v1702_v51, %v1568_v6  ;;  %v4329_v18 = vmax.f32 %v4328_v10, 0.0  ;;  %v1583_v6 = vld [vmem:[%s2371_s5] sm:$0xff] }
 0x309   : > { %v1570_v44 = vsel %vm1448_vm9, %v4327_v14, 0.0  ;;  %v4331_v28 = vmax.f32 %v4330_v46, 0.0  ;;  %v1389_v17 = vadd.s32 %v3296_v48, %v1324_v62  ;;  %vm1451_vm12 = vcmp.lt.s32.totalorder %v1387_v29, 1000  ;;  %v1584_v29 = vld [vmem:[%s2371_s5 + $0x8] sm:$0xff] }
 0x30a   : > { %v1571_v56 = vsel %vm1449_vm10, %v4329_v18, 0.0  ;;  %v1641_v40 = vadd.f32 %v1640_v24, %v1569_v15  ;;  %v1704_v43 = vadd.f32 %v1703_v32, %v1570_v44  ;;  %v4333_v4 = vmax.f32 %v4332_v35, 0.0 }
 0x30b   : > { %v1572_v63 = vsel %vm1449_vm10, %v4331_v28, 0.0  ;;  %v4335_v26 = vmax.f32 %v4334_v61, 0.0  ;;  %v1390_v30 = vadd.s32 %v3296_v48, %v1325_v3  ;;  %vm1452_vm13 = vcmp.lt.s32.totalorder %v1388_v12, 1000 }
 0x30c   : > { %v1573_v34 = vsel %vm1450_vm11, %v4333_v4, 0.0  ;;  %v1642_v21 = vadd.f32 %v1641_v40, %v1571_v56  ;;  %v1705_v20 = vadd.f32 %v1704_v43, %v1572_v63  ;;  %v4337_v45 = vmax.f32 %v4336_v23, 0.0 }
 0x30d   : > { %v1574_v7 = vsel %vm1450_vm11, %v4335_v26, 0.0  ;;  %v4339_v57 = vmax.f32 %v4338_v11, 0.0  ;;  %vm1453_vm14 = vcmp.lt.s32.totalorder %v1389_v17, 1000  ;;  %v4341_v41 = vmax.f32 %v4340_v37, 0.0 }
 0x30e   : > { %v1575_v53 = vsel %vm1451_vm12, %v4337_v45, 0.0  ;;  %v1643_v52 = vadd.f32 %v1642_v21, %v1573_v34  ;;  %v1706_v50 = vadd.f32 %v1705_v20, %v1574_v7  ;;  %v4343_v49 = vmax.f32 %v4342_v8, 0.0 }
 0x30f   : > { %v1576_v42 = vsel %vm1451_vm12, %v4339_v57, 0.0  ;;  %v1577_v31 = vsel %vm1452_vm13, %v4341_v41, 0.0  ;;  %vm1454_vm15 = vcmp.lt.s32.totalorder %v1390_v30, 1000  ;;  %v4344_v16 = vmax.f32 %v3003_v59, 0.0 }
 0x310   : > { %v1578_v48 = vsel %vm1452_vm13, %v4343_v49, 0.0  ;;  %v1644_v36 = vadd.f32 %v1643_v52, %v1575_v53  ;;  %v1707_v58 = vadd.f32 %v1706_v50, %v1576_v42  ;;  %v4346_v5 = vmax.f32 %v4345_v60, 0.0 }
 0x311   : > { %v1579_v27 = vsel %vm1453_vm14, %v4344_v16, 0.0  ;;  %v4348_v55 = vmax.f32 %v4347_v9, 0.0  ;;  %v4350_v47 = vmax.f32 %v4349_v1, 0.0 }
 0x312   : > { %v1580_v2 = vsel %vm1453_vm14, %v4346_v5, 0.0  ;;  %v1645_v39 = vadd.f32 %v1644_v36, %v1577_v31  ;;  %v1708_v33 = vadd.f32 %v1707_v58, %v1578_v48 }
 0x313   : > { %v1581_v62 = vsel %vm1454_vm15, %v4348_v55, 0.0  ;;  %v1582_v0 = vsel %vm1454_vm15, %v4350_v47, 0.0 }
 0x314   : > { %v1646_v13 = vadd.f32 %v1645_v39, %v1579_v27  ;;  %v1709_v25 = vadd.f32 %v1708_v33, %v1580_v2 }
 0x316   : > { %v1647_v38 = vadd.f32 %v1646_v13, %v1581_v62  ;;  %v1710_v51 = vadd.f32 %v1709_v25, %v1582_v0 }
 0x318   : > { %v1711_v59 = vadd.f32 %v1647_v38, %v1583_v6  ;;  %v1712_v3 = vadd.f32 %v1710_v51, %v1584_v29 }
 0x31a   : > { %1713 = vst [vmem:[%s2371_s5] sm:$0xff] %v1711_v59  ;;  %1714 = vst [vmem:[%s2371_s5 + $0x8] sm:$0xff] %v1712_v3 }
 0x31b PF: > { %s1883_s30 = sshll.u32 %s2170_s15, 8  ;;  %s1730_s21 = sshll.u32 %s2371_s5, 4  ;;  %s1731_s21 = int_to_ptr.vmem [resolvable:$true] %s1730_s21 }
 0x31c   : > { %s3689_s19 = scalar_lea.hbm %s3736_s3, %s1883_s30  ;;  %s1716_s6 = scalar_lea.sflag [#allocation4], %s2356_s8 }
 0x31d   : > { %s2092_s7 = scalar_lea.vmem %s1731_s21, 256  ;;  %p4351_p1 = scmp.ne.s32.totalorder %s3834_s26, 0 }
 0x31e   : > { %p2093_p13 = scmp.ne.s32.totalorder %s1731_s21, %s2092_s7  ;;  %s2187_s9 = smov [#allocation7]  }
 0x31f   : > { %s2096_s10 = sshll.u32 %s2187_s9, 4  ;;  %s2097_s10 = int_to_ptr.vmem [resolvable:$false] %s2096_s10 }
 0x320   : > { %p2094_p11 = pnand %p2093_p13, %p4351_p1  ;;  %s2098_s4 = scalar_lea.vmem %s2097_s10, 512 }
 0x321   : > { %p2099_p8 = scmp.lt.s32.totalorder %s1731_s21, %s2097_s10  ;;  %p2100_p9 = scmp.lt.s32.totalorder %s2098_s4, %s2092_s7 }
 0x322   : > { %p2095_p4 = pneg %p2094_p11 }
 0x323   : > { %p2101_p2 = por %p2100_p9, %p2099_p8 }
 0x325   : > { %p2102_p6 = pnand %p2101_p2, %p2095_p4 }
 0x327   : > { %2105 = shalt.err (!%p2102_p6)
}
 0x328   : > { %s2106_s15 = scalar_lea.hbm %s3689_s19, 256  ;;  %s2110_s5 = scalar_lea.hbm %s3736_s3, 512 }
 0x329   : > { %p2107_p0 = scmp.ne.s32.totalorder %s3689_s19, %s2106_s15  ;;  %p2111_p10 = scmp.lt.u32.totalorder %s3689_s19, %s3736_s3 }
 0x32a   : > { %p2112_p12 = scmp.lt.u32.totalorder %s2110_s5, %s2106_s15  ;;  %p2114_p11 = scmp.lt.u32.totalorder %s2106_s15, %s3689_s19 }
 0x32b   : > { %p2108_p7 = pnand %p2107_p0, %p4351_p1 }
 0x32c   : > { %p2113_p13 = por %p2112_p12, %p2111_p10 }
 0x32d   : > { %p2109_p5 = pneg %p2108_p7 }
 0x32e   : > { %p2115_p4 = por %p2114_p11, %p2113_p13 }
 0x330   : > { %p2116_p8 = pnand %p2115_p4, %p2109_p5 }
 0x332   : > { %2119 = shalt.err (!%p2116_p8)
}
 0x333   : > { %1921 = dma.vmem_to_hbm [thread:$0]  (%p4351_p1), %s1731_s21, 256, %s3689_s19, %s1716_s6  }
 0x334 PF: > { %s1742_s11 = sand.u32 1, %s2158_s12   ;;  %p4352_p9 = scmp.ne.s32.totalorder %s3835_s28, 0 }
 0x335   : > { %s1743_s24 = scalar_lea.sflag [#allocation4], %s1742_s11 }
 0x336   : > { %p1928_p2 = pnand %p1823_p3, %p4352_p9 }
 0x338   : > { %2153 = dma.done.wait (!%p1928_p2), %s1743_s24, 256  }
 0x339   : > { %2155 = vsyncadd (!%p1928_p2), %s1743_s24, 4294967040  ;;  %s20_s17 = sadd.s32 1, %s2178_s17   ;;  %s4353_s12 = smov %s2162_s13 }
 0x33a   : > { %p17_p6 = scmp.ge.s32.totalorder %s20_s17, 4   ;;  %s4354_s13 = smov %s2166_s14 }
 0x33b   : > { %s4355_s14 = smov %s2270_s27  ;;  %s4356_s15 = smov %s2174_s16 }
 0x33c   : > { %s4357_s16 = smov %s4359_s20  ;;  %19 = sbr.rel (!%p17_p6) target bundleno = 7 (0x7), region = 93 }
 0x343   :  { %1748 = vsyncpa [#allocation3], 1 }
 0x344   :  { %1750 = vsyncpa [#allocation3 + $0x1], 1 }
 0x345   :  { %1751 = vsyncpa [#allocation6], 1 }
 0x346   :  { %1752 = vsyncpa [#allocation4], 1 }
 0x347   :  { %1754 = vsyncpa [#allocation4 + $0x1], 1 }

</bundles_post_ra>
